<compile_context>
chip_gen: v7x
topology: tpu7x:2x2x1
jax: 0.10.0
libtpu: 0.0.40
codegen_flags: <defaults>
</compile_context>

<pallas_src>
import functools

import jax
import jax.numpy as jnp
from jax import lax
from jax.experimental import pallas as pl
from jax.experimental.pallas import tpu as pltpu


def _conv_block_kernel(x_ref, w_ref, o_ref, *, Hout, Wout, K, in_kernel_pad, eps, slope):
    """One batch element per grid step.

    x_ref : (1, Hin, Win, Cin)    NHWC input tile (unpadded if in_kernel_pad, else pre-padded)
    w_ref : (Cout, K*K*Cin)       conv weights, contraction axis ordered (kh, kw, cin)
    o_ref : (1, Cout, Hout*Wout)  lane-dense output tile (flattened NCHW)
    """
    x = x_ref[0]

    if in_kernel_pad:
        # ReflectionPad2d(1) built directly in VMEM: halo rows/cols mirror the 2nd row/col.
        H, W = x.shape[0], x.shape[1]
        x = jnp.concatenate([x[1:2], x, x[H - 2:H - 1]], axis=0)
        x = jnp.concatenate([x[:, 1:2], x, x[:, W - 2:W - 1]], axis=1)

    Cin = x.shape[-1]

    # im2col patch matrix (Hout*Wout, K*K*Cin); column order (kh, kw, cin) matches w_ref.
    cols = []
    for kh in range(K):
        for kw in range(K):
            cols.append(x[kh:kh + Hout, kw:kw + Wout, :].reshape(Hout * Wout, Cin))
    pmat = jnp.concatenate(cols, axis=1)

    # Single fused MXU matmul: (Cout, K*K*Cin) x (Hout*Wout, K*K*Cin)^T -> (Cout, Hout*Wout).
    y = lax.dot_general(w_ref[...], pmat,
                        dimension_numbers=(((1,), (1,)), ((), ())),
                        preferred_element_type=jnp.float32)

    # InstanceNorm2d (per-sample, per-channel, biased variance, no affine); stats in one pass,
    # kept in f32. Lane-axis reduce since Hout*Wout sits on lanes.
    inv_n = 1.0 / (Hout * Wout)
    mean = jnp.sum(y, axis=1, keepdims=True) * inv_n
    var = jnp.maximum(jnp.sum(y * y, axis=1, keepdims=True) * inv_n - mean * mean, 0.0)
    y = (y - mean) * lax.rsqrt(var + eps)

    # LeakyReLU(0.2)
    o_ref[0] = jnp.where(y >= 0, y, slope * y)


def conv_block_forward(x_nchw, weight, bias=None, *, padding=1, eps=1e-5, slope=0.2):
    """x_nchw: (N, Cin, H, W); weight: (Cout, Cin, K, K) [PyTorch layout]; bias: (Cout,) or None.

    Matches ConvBlock.forward (stride 1). `bias` is accepted for API parity with
    nn.Conv2d(bias=True) but is unused: the affine-less InstanceNorm2d subtracts the
    per-channel mean, which cancels a per-channel constant exactly.
    """
    del bias
    N, Cin, H, W = x_nchw.shape
    Cout, Cin_w, K, K2 = weight.shape
    assert Cin == Cin_w and K == K2

    # TODO(synk): stride > 1 and a spatially tiled two-pass variant (needed for very large
    # images on v7x's 64 MiB VMEM and for megacore occupancy when N == 1) are not implemented.

    x_nhwc = jnp.transpose(x_nchw, (0, 2, 3, 1)).astype(jnp.float32)

    in_kernel_pad = (padding == 1)
    if (not in_kernel_pad) and padding > 0:
        # Fallback for non-default padding widths: reflect-pad in the wrapper.
        x_nhwc = jnp.pad(
            x_nhwc, ((0, 0), (padding, padding), (padding, padding), (0, 0)), mode="reflect")

    Hp, Wp = H + 2 * padding, W + 2 * padding
    Hout, Wout = Hp - K + 1, Wp - K + 1
    Hin, Win = (H, W) if in_kernel_pad else (Hp, Wp)

    # Weights as one (Cout, K*K*Cin) matmul operand, contraction ordered (kh, kw, cin).
    w_mat = jnp.transpose(weight, (0, 2, 3, 1)).reshape(Cout, K * K * Cin).astype(jnp.float32)
    # NOTE: on v6e/v7x, casting x_nhwc / w_mat to bf16 (accumulation stays f32 via
    # preferred_element_type) halves DMA bytes; kept f32 here for exact parity with the
    # f32 reference (and v5e's f32-only VPU epilogue).

    kernel = functools.partial(_conv_block_kernel, Hout=Hout, Wout=Wout, K=K,
                               in_kernel_pad=in_kernel_pad, eps=eps, slope=slope)

    out_flat = pl.pallas_call(
        kernel,
        out_shape=jax.ShapeDtypeStruct((N, Cout, Hout * Wout), jnp.float32),
        grid_spec=pltpu.PrefetchScalarGridSpec(
            num_scalar_prefetch=0,
            grid=(N,),
            in_specs=[
                pl.BlockSpec((1, Hin, Win, Cin), lambda n: (n, 0, 0, 0)),
                pl.BlockSpec((Cout, K * K * Cin), lambda n: (0, 0)),
            ],
            out_specs=pl.BlockSpec((1, Cout, Hout * Wout), lambda n: (n, 0, 0)),
        ),
        compiler_params=pltpu.CompilerParams(
            dimension_semantics=("parallel",)),
    )(x_nhwc, w_mat)

    # Free reshape back to NCHW (contiguous): (N, Cout, Hout*Wout) -> (N, Cout, Hout, Wout).
    return out_flat.reshape(N, Cout, Hout, Wout)


def _reference(x_nchw, weight, bias, *, padding=1, eps=1e-5, slope=0.2):
    """Pure-JAX reference of the PyTorch ConvBlock forward (for correctness check)."""
    x = jnp.pad(x_nchw, ((0, 0), (0, 0), (padding, padding), (padding, padding)),
                mode="reflect")
    y = lax.conv_general_dilated(
        x, weight, window_strides=(1, 1), padding="VALID",
        dimension_numbers=("NCHW", "OIHW", "NCHW"))
    y = y + bias.reshape(1, -1, 1, 1)
    mean = jnp.mean(y, axis=(2, 3), keepdims=True)
    var = jnp.mean((y - mean) ** 2, axis=(2, 3), keepdims=True)
    y = (y - mean) / jnp.sqrt(var + eps)
    return jnp.where(y >= 0, y, slope * y)


if __name__ == "__main__":
    # small shapes consistent with the module
    N, Cin, Cout, H, W, K = 2, 4, 8, 16, 16, 3

    key = jax.random.PRNGKey(0)
    kx, kw, kb = jax.random.split(key, 3)
    x = jax.random.normal(kx, (N, Cin, H, W), dtype=jnp.float32)
    weight = 0.1 * jax.random.normal(kw, (Cout, Cin, K, K), dtype=jnp.float32)
    bias = 0.1 * jax.random.normal(kb, (Cout,), dtype=jnp.float32)

    out = conv_block_forward(x, weight, bias)
    out = jax.block_until_ready(out)

    ref = _reference(x, weight, bias)
    assert out.shape == (N, Cout, H, W)
    assert jnp.allclose(out, ref, atol=1e-4, rtol=1e-4)

    print("KERNEL_OK")
</pallas_src>

<mosaic_0001>
module attributes {stable_mosaic.version = 11 : i64} {
  func.func @_conv_block_kernel(%arg0: i32, %arg1: memref<1x16x16x4xf32, #tpu.memory_space<vmem>>, %arg2: memref<8x36xf32, #tpu.memory_space<vmem>>, %arg3: memref<1x8x256xf32, #tpu.memory_space<vmem>>) attributes {dimension_semantics = [#tpu.dimension_semantics<parallel>], iteration_bounds = array<i64: 2>, scalar_prefetch = 0 : i64, scratch_operands = 0 : i64, tpu.core_type = #tpu.core_type<tc>, window_params = [{transform_indices = @transform_0, window_bounds = array<i64: 1, 16, 16, 4>}, {pipeline_mode = #tpu.pipeline_mode<synchronous>, transform_indices = @transform_1, window_bounds = array<i64: 8, 36>}, {transform_indices = @transform_2, window_bounds = array<i64: 1, 8, 256>}]} {
    %c0 = arith.constant 0 : index
    %c0_0 = arith.constant 0 : index
    %c0_1 = arith.constant 0 : index
    %c0_2 = arith.constant 0 : index
    %0 = vector.load %arg1[%c0, %c0_0, %c0_1, %c0_2] : memref<1x16x16x4xf32, #tpu.memory_space<vmem>>, vector<1x16x16x4xf32>
    %1 = vector.shape_cast %0 : vector<1x16x16x4xf32> to vector<16x16x4xf32>
    %2 = vector.extract_strided_slice %1 {offsets = [1, 0, 0], sizes = [1, 16, 4], strides = [1, 1, 1]} : vector<16x16x4xf32> to vector<1x16x4xf32>
    %3 = vector.extract_strided_slice %1 {offsets = [14, 0, 0], sizes = [1, 16, 4], strides = [1, 1, 1]} : vector<16x16x4xf32> to vector<1x16x4xf32>
    %4 = tpu.concatenate %2, %1, %3 in 0 : vector<1x16x4xf32>, vector<16x16x4xf32>, vector<1x16x4xf32> -> vector<18x16x4xf32>
    %5 = vector.extract_strided_slice %4 {offsets = [0, 1, 0], sizes = [18, 1, 4], strides = [1, 1, 1]} : vector<18x16x4xf32> to vector<18x1x4xf32>
    %6 = vector.extract_strided_slice %4 {offsets = [0, 14, 0], sizes = [18, 1, 4], strides = [1, 1, 1]} : vector<18x16x4xf32> to vector<18x1x4xf32>
    %7 = tpu.concatenate %5, %4, %6 in 1 : vector<18x1x4xf32>, vector<18x16x4xf32>, vector<18x1x4xf32> -> vector<18x18x4xf32>
    %8 = vector.extract_strided_slice %7 {offsets = [0, 0, 0], sizes = [16, 16, 4], strides = [1, 1, 1]} : vector<18x18x4xf32> to vector<16x16x4xf32>
    %9 = vector.shape_cast %8 : vector<16x16x4xf32> to vector<256x4xf32>
    %10 = vector.extract_strided_slice %7 {offsets = [0, 1, 0], sizes = [16, 16, 4], strides = [1, 1, 1]} : vector<18x18x4xf32> to vector<16x16x4xf32>
    %11 = vector.shape_cast %10 : vector<16x16x4xf32> to vector<256x4xf32>
    %12 = vector.extract_strided_slice %7 {offsets = [0, 2, 0], sizes = [16, 16, 4], strides = [1, 1, 1]} : vector<18x18x4xf32> to vector<16x16x4xf32>
    %13 = vector.shape_cast %12 : vector<16x16x4xf32> to vector<256x4xf32>
    %14 = vector.extract_strided_slice %7 {offsets = [1, 0, 0], sizes = [16, 16, 4], strides = [1, 1, 1]} : vector<18x18x4xf32> to vector<16x16x4xf32>
    %15 = vector.shape_cast %14 : vector<16x16x4xf32> to vector<256x4xf32>
    %16 = vector.extract_strided_slice %7 {offsets = [1, 1, 0], sizes = [16, 16, 4], strides = [1, 1, 1]} : vector<18x18x4xf32> to vector<16x16x4xf32>
    %17 = vector.shape_cast %16 : vector<16x16x4xf32> to vector<256x4xf32>
    %18 = vector.extract_strided_slice %7 {offsets = [1, 2, 0], sizes = [16, 16, 4], strides = [1, 1, 1]} : vector<18x18x4xf32> to vector<16x16x4xf32>
    %19 = vector.shape_cast %18 : vector<16x16x4xf32> to vector<256x4xf32>
    %20 = vector.extract_strided_slice %7 {offsets = [2, 0, 0], sizes = [16, 16, 4], strides = [1, 1, 1]} : vector<18x18x4xf32> to vector<16x16x4xf32>
    %21 = vector.shape_cast %20 : vector<16x16x4xf32> to vector<256x4xf32>
    %22 = vector.extract_strided_slice %7 {offsets = [2, 1, 0], sizes = [16, 16, 4], strides = [1, 1, 1]} : vector<18x18x4xf32> to vector<16x16x4xf32>
    %23 = vector.shape_cast %22 : vector<16x16x4xf32> to vector<256x4xf32>
    %24 = vector.extract_strided_slice %7 {offsets = [2, 2, 0], sizes = [16, 16, 4], strides = [1, 1, 1]} : vector<18x18x4xf32> to vector<16x16x4xf32>
    %25 = vector.shape_cast %24 : vector<16x16x4xf32> to vector<256x4xf32>
    %26 = tpu.concatenate %9, %11, %13, %15, %17, %19, %21, %23, %25 in 1 : vector<256x4xf32>, vector<256x4xf32>, vector<256x4xf32>, vector<256x4xf32>, vector<256x4xf32>, vector<256x4xf32>, vector<256x4xf32>, vector<256x4xf32>, vector<256x4xf32> -> vector<256x36xf32>
    %c0_3 = arith.constant 0 : index
    %c0_4 = arith.constant 0 : index
    %27 = vector.load %arg2[%c0_3, %c0_4] : memref<8x36xf32, #tpu.memory_space<vmem>>, vector<8x36xf32>
    %cst = arith.constant dense<0.000000e+00> : vector<8x256xf32>
    %28 = tpu.matmul %27, %26, %cst {dimension_numbers = #tpu.dot_dimension_numbers<[1], [1], [0], [0], [0, 0, 1, 0], [], []>} : vector<8x36xf32>, vector<256x36xf32>, vector<8x256xf32> -> vector<8x256xf32>
    %cst_5 = arith.constant dense<0.000000e+00> : vector<8xf32>
    %29 = vector.multi_reduction <add>, %28, %cst_5 [1] : vector<8x256xf32> to vector<8xf32>
    %30 = vector.shape_cast %29 : vector<8xf32> to vector<8x1xf32>
    %cst_6 = arith.constant 3.906250e-03 : f32
    %31 = vector.broadcast %cst_6 : f32 to vector<8x1xf32>
    %32 = arith.mulf %30, %31 : vector<8x1xf32>
    %33 = arith.mulf %28, %28 : vector<8x256xf32>
    %cst_7 = arith.constant dense<0.000000e+00> : vector<8xf32>
    %34 = vector.multi_reduction <add>, %33, %cst_7 [1] : vector<8x256xf32> to vector<8xf32>
    %35 = vector.shape_cast %34 : vector<8xf32> to vector<8x1xf32>
    %cst_8 = arith.constant 3.906250e-03 : f32
    %36 = vector.broadcast %cst_8 : f32 to vector<8x1xf32>
    %37 = arith.mulf %35, %36 : vector<8x1xf32>
    %38 = arith.mulf %32, %32 : vector<8x1xf32>
    %39 = arith.subf %37, %38 : vector<8x1xf32>
    %cst_9 = arith.constant 0.000000e+00 : f32
    %40 = vector.broadcast %cst_9 : f32 to vector<8x1xf32>
    %41 = arith.maximumf %39, %40 : vector<8x1xf32>
    %42 = vector.broadcast %32 : vector<8x1xf32> to vector<8x256xf32>
    %43 = arith.subf %28, %42 : vector<8x256xf32>
    %cst_10 = arith.constant 9.99999974E-6 : f32
    %44 = vector.broadcast %cst_10 : f32 to vector<8x1xf32>
    %45 = arith.addf %41, %44 : vector<8x1xf32>
    %46 = math.rsqrt %45 : vector<8x1xf32>
    %47 = vector.broadcast %46 : vector<8x1xf32> to vector<8x256xf32>
    %48 = arith.mulf %43, %47 : vector<8x256xf32>
    %cst_11 = arith.constant 0.000000e+00 : f32
    %49 = vector.broadcast %cst_11 : f32 to vector<8x256xf32>
    %50 = arith.cmpf oge, %48, %49 : vector<8x256xf32>
    %cst_12 = arith.constant 2.000000e-01 : f32
    %51 = vector.broadcast %cst_12 : f32 to vector<8x256xf32>
    %52 = arith.mulf %51, %48 : vector<8x256xf32>
    %53 = arith.select %50, %48, %52 : vector<8x256xi1>, vector<8x256xf32>
    %c0_13 = arith.constant 0 : index
    %c0_14 = arith.constant 0 : index
    %c0_15 = arith.constant 0 : index
    %54 = vector.load %arg3[%c0_13, %c0_14, %c0_15] : memref<1x8x256xf32, #tpu.memory_space<vmem>>, vector<1x8x256xf32>
    %55 = vector.shape_cast %54 : vector<1x8x256xf32> to vector<8x256xf32>
    %56 = vector.shape_cast %53 : vector<8x256xf32> to vector<1x8x256xf32>
    tpu.vector_store %arg3[%c0_13, %c0_14, %c0_15], %56 {strides = array<i32>} : memref<1x8x256xf32, #tpu.memory_space<vmem>>, vector<1x8x256xf32>,
    return
  }
  func.func @transform_0(%arg0: i32) -> (i32, i32, i32, i32) {
    %c0_i32 = arith.constant 0 : i32
    %c0_i32_0 = arith.constant 0 : i32
    %c0_i32_1 = arith.constant 0 : i32
    %c0_i32_2 = arith.constant 0 : i32
    return %arg0, %c0_i32, %c0_i32_0, %c0_i32_1 : i32, i32, i32, i32
  }
  func.func @transform_1(%arg0: i32) -> (i32, i32) {
    %c0_i32 = arith.constant 0 : i32
    %c0_i32_0 = arith.constant 0 : i32
    %c0_i32_1 = arith.constant 0 : i32
    return %c0_i32, %c0_i32_0 : i32, i32
  }
  func.func @transform_2(%arg0: i32) -> (i32, i32, i32) {
    %c0_i32 = arith.constant 0 : i32
    %c0_i32_0 = arith.constant 0 : i32
    %c0_i32_1 = arith.constant 0 : i32
    return %arg0, %c0_i32, %c0_i32_0 : i32, i32, i32
  }
}

</mosaic_0001>

<bundles_post_ra>
// kernel: tpu_custom_call.1
= control target key start
LH: loop header
LB: loop body
LE: loop exit
PB: predicated region body
PF: predicated region fallthrough
CT: control target
= control target key end

     0   :  { %7 = vsyncpa [#allocation3], 0  ;;  %s3999_s0 = inlined_call_operand.vmem [shape: f32[2,16,16,4], index: 0, kind: input, shape index: {}]   ;;  %s4000_s1 = inlined_call_operand.vmem [shape: f32[8,36], index: 1, kind: input, shape index: {}]   ;;  %s4001_s2 = inlined_call_operand.hbm [shape: f32[2,8,256], index: 2, kind: output, shape index: {}]  }
   0x1   :  { %9 = vsyncpa [#allocation3 + $0x1], 0  ;;  %s2744_s9 = smov 0   ;;  %s2746_s10 = smov 0  }
   0x2   :  { %s2748_s11 = smov 0   ;;  %s2750_s12 = smov 0  }
   0x3 LB: > { %s2765_s13 = sadd.s32 4294967295, %s2718_s12   ;;  %s1863_s14 = sadd.s32 4294967294, %s2718_s12   ;;  %s2718_s12 = sphi %s2750_s12, %s4114_s12   ;;  %s2714_s11 = sphi %s2748_s11, %s4113_s11   ;;  %s2710_s10 = sphi %s2746_s10, %s4112_s10   ;;  %s2706_s9 = sphi %s2744_s9, %s4111_s9  }
   0x4   : > { %s2769_s15 = sadd.s32 1, %s2718_s12   ;;  %s69_s16 = sadd.s32 1, %s2714_s11 }
   0x5   : > { %s66_s17 = ssub.s32 %s2718_s12, %s2769_s15  ;;  %p79_p0 = scmp.ne.s32.totalorder %s2714_s11, %s2710_s10 }
   0x6   : > { %p67_p1 = scmp.eq.s32.totalorder %s66_s17, 0  ;;  %p80_p2 = scmp.eq.s32.totalorder %s2765_s13, 1 }
   0x7   : > { %p85_p3 = scmp.ne.s32.totalorder %s2710_s10, %s2706_s9  ;;  %p86_p4 = scmp.eq.s32.totalorder %s1863_s14, 1 }
   0x8   : > { %s2780_s18 = scalar_select %p67_p1, %s2714_s11, %s69_s16  }
   0x9   : > { %p2782_p5 = por %p80_p2, %p79_p0  ;;  %p2786_p6 = por %p86_p4, %p85_p3 }
   0xa   : > { %p1866_p7 = scmp.ge.s32.totalorder %s2718_s12, 1  ;;  %p115_p8 = scmp.lt.s32.totalorder %s2718_s12, 3 }
   0xc   : > { %p116_p9 = pnand %p1866_p7, %p115_p8 }
   0xe   : > { %119 = sbr.rel (%p116_p9) target bundleno = 823 (0x337), region = 28 }
  0x15   : > { %p137_p10 = scmp.lt.s32.totalorder %s2765_s13, 1  ;;  %vm238_vm0 = vcmask 1040384   ;;  %vm428_vm1 = vcmask 1046528   ;;  %s2720_s26 = smov 4   ;;  %vm504_vm2 = vcmask 1045504   ;;  %vm1330_vm3 = vcmask 31744  }
  0x16   : > { %s2721_s27 = smov 8   ;;  %s2722_s28 = smov 12   ;;  %vm1361_vm4 = vcmask 64512   ;;  %vm1392_vm5 = vcmask 97280   ;;  %vm1425_vm6 = vcmask 130048   ;;  %vm1458_vm7 = vcmask 162816  }
  0x17   : > { %s138_s21 = scalar_select %p137_p10, %s2765_s13, 1  ;;  %vm1491_vm8 = vcmask 195584   ;;  %vm1524_vm9 = vcmask 228352   ;;  %vm1557_vm10 = vcmask 261120   ;;  %vm1591_vm11 = vcmask 293888  }
  0x18   : > { %s2723_s29 = smov 16   ;;  %s2724_s30 = smov 20   ;;  %vm3432_vm12 = vmpackc.low %vm1591_vm11, %vm1591_vm11 }
  0x19   : > { %s1908_s22 = sshll.u32 %s138_s21, 8  ;;  %s2725_s3 = smov 24  }
  0x1a   : > { %s2797_s25 = scalar_lea.vmem %s3999_s0, %s1908_s22  ;;  %s2726_s4 = smov 28  }
  0x1b   : > { %v146_v0 = vld [vmem:[%s2797_s25 + $0x20] sm:$0xff]  ;;  %v147_v1 = vld [vmem:[%s2797_s25 + $0x28] sm:$0xff]  ;;  %v144_v2 = vld [vmem:[%s2797_s25 + $0x10] sm:$0xff]  ;;  %s2727_s5 = smov 32   ;;  %s134_s8 = sand.u32 1, %s2710_s10  }
  0x1c   : > { %v192_v3 = vrot.slane %v146_v0, 1  ;;  %v245_v4 = vrot.slane %v146_v0, 7  ;;  %v246_v5 = vrot.slane %v147_v1, 7  ;;  %v336_v6 = vrot.slane %v147_v1, 5  ;;  %v145_v7 = vld [vmem:[%s2797_s25 + $0x18] sm:$0xff]  ;;  %v148_v8 = vld [vmem:[%s2797_s25 + $0x30] sm:$0xff] }
  0x1d   : > { %v190_v9 = vrot.slane %v144_v2, 1  ;;  %v239_v10 = vrot.slane %v144_v2, 7  ;;  %v240_v11 = vrot.slane %v145_v7, 7  ;;  %v334_v12 = vrot.slane %v145_v7, 5  ;;  %v149_v19 = vld [vmem:[%s2797_s25 + $0x38] sm:$0xff]  ;;  %v142_v25 = vld [vmem:[%s2797_s25] sm:$0xff] }
  0x1e   : > { %v2805_v13 = vsel %vm238_vm0, %v245_v4, %v246_v5  ;;  %v2808_v14 = vsel %vm238_vm0, %v192_v3, %v245_v4  ;;  %v2811_v15 = vsel %vm238_vm0, %v246_v5, %v336_v6  ;;  %v193_v20 = vrot.slane %v148_v8, 1  ;;  %v143_v34 = vld [vmem:[%s2797_s25 + $0x8] sm:$0xff]  ;;  %v152_v39 = vld [vmem:[%s2797_s25 + $0x50] sm:$0xff]  ;;  %v153_v48 = vld [vmem:[%s2797_s25 + $0x58] sm:$0xff]  ;;  %s1867_s14 = sshll.u32 %s134_s8, 4  ;;  %s1909_s16 = sshll.u32 %s2765_s13, 8 }
  0x1f   : > { %v439_v16 = vrot.slane %v2808_v14, 1  ;;  %v440_v17 = vrot.slane %v2805_v13, 1  ;;  %v442_v18 = vrot.slane %v2811_v15, 1  ;;  %v2818_v21 = vsel %vm238_vm0, %v239_v10, %v240_v11  ;;  %v150_v57 = vld [vmem:[%s2797_s25 + $0x40] sm:$0xff]  ;;  %v151_v2 = vld [vmem:[%s2797_s25 + $0x48] sm:$0xff]  ;;  %v156_v7 = vld [vmem:[%s2797_s25 + $0x70] sm:$0xff]  ;;  %s3957_s24 = scalar_lea.hbm %s4001_s2, %s1909_s16 }
  0x20   : > { %v2821_v22 = vsel %vm238_vm0, %v190_v9, %v239_v10  ;;  %v2824_v23 = vsel %vm238_vm0, %v240_v11, %v334_v12  ;;  %v248_v24 = vrot.slane %v148_v8, 7  ;;  %v430_v29 = vrot.slane %v2818_v21, 1  ;;  %s136_s17 = scalar_lea.vmem [#allocation2], %s1867_s14  ;;  %s1790_s13 = scalar_lea.sflag [#allocation3], %s134_s8 }
  0x21   : > { %v441_v26 = vsel %vm428_vm1, %v439_v16, %v440_v17  ;;  %v443_v27 = vsel %vm428_vm1, %v440_v17, %v442_v18  ;;  %v429_v28 = vrot.slane %v2821_v22, 1  ;;  %v432_v31 = vrot.slane %v2824_v23, 1  ;;  %s1804_s21 = sshll.u32 %s136_s17, 4  ;;  %s3959_s21 = int_to_ptr.vmem [resolvable:$true] %s1804_s21 }
  0x22   : > { %v2831_v30 = vpack.i.bf16 %v443_v27, %v441_v26  ;;  %v249_v33 = vrot.slane %v149_v19, 7  ;;  %v337_v36 = vrot.slane %v149_v19, 5  ;;  %v2838_v37 = vsel %vm238_vm0, %v193_v20, %v248_v24  ;;  %v157_v19 = vld [vmem:[%s2797_s25 + $0x78] sm:$0xff]  ;;  %v154_v27 = vld [vmem:[%s2797_s25 + $0x60] sm:$0xff] }
  0x23   : > { %v431_v35 = vsel %vm428_vm1, %v429_v28, %v430_v29  ;;  %4044 = vst [vmem:[#allocation5_spill] sm:$0xff] %v2838_v37  ;;  %v191_v38 = vrot.slane %v142_v25, 1  ;;  %v433_v40 = vsel %vm428_vm1, %v430_v29, %v432_v31  ;;  %v444_v42 = vrot.slane %v2838_v37, 1 }
  0x24   : > { %2050 = vrot.lane.b32.xlu1 %v2831_v30, %s2720_s26  ;;  %v2845_v41 = vsel %vm238_vm0, %v248_v24, %v249_v33  ;;  %v242_v43 = vrot.slane %v142_v25, 7  ;;  %v2848_v44 = vpack.i.bf16 %v433_v40, %v431_v35  ;;  %v2851_v45 = vsel %vm238_vm0, %v249_v33, %v337_v36 }
  0x25   : > { %4045 = vst [vmem:[#allocation6_spill] sm:$0xff] %v2845_v41  ;;  %v445_v46 = vrot.slane %v2845_v41, 1  ;;  %v243_v47 = vrot.slane %v143_v34, 7  ;;  %v447_v49 = vrot.slane %v2851_v45, 1  ;;  %v335_v50 = vrot.slane %v143_v34, 5 }
  0x26   : > { %v2857_v51 = vsel %vm238_vm0, %v191_v38, %v242_v43  ;;  %v195_v52 = vrot.slane %v152_v39, 1  ;;  %2040 = vrot.lane.b32.xlu0 %v2848_v44, %s2720_s26  ;;  %v254_v56 = vrot.slane %v152_v39, 7  ;;  %v255_v61 = vrot.slane %v153_v48, 7  ;;  %v155_v39 = vld [vmem:[%s2797_s25 + $0x68] sm:$0xff] }
  0x27   : > { %v446_v53 = vsel %vm428_vm1, %v444_v42, %v445_v46  ;;  %v2863_v54 = vsel %vm238_vm0, %v242_v43, %v243_v47  ;;  %v434_v55 = vrot.slane %v2857_v51, 1  ;;  %v448_v58 = vsel %vm428_vm1, %v445_v46, %v447_v49 }
  0x28   : > { %v2869_v59 = vsel %vm238_vm0, %v243_v47, %v335_v50  ;;  %v435_v60 = vrot.slane %v2863_v54, 1  ;;  %v2872_v62 = vpack.i.bf16 %v448_v58, %v446_v53  ;;  %v339_v0 = vrot.slane %v153_v48, 5  ;;  %v160_v47 = vld [vmem:[%s2797_s25 + $0x90] sm:$0xff]  ;;  %v161_v58 = vld [vmem:[%s2797_s25 + $0x98] sm:$0xff] }
  0x29   : > { %v437_v63 = vrot.slane %v2869_v59, 1  ;;  %v2876_v1 = vsel %vm238_vm0, %v195_v52, %v254_v56  ;;  %v2881_v4 = vsel %vm238_vm0, %v254_v56, %v255_v61  ;;  %v194_v6 = vrot.slane %v150_v57, 1 }
  0x2a   : > { %4046 = vst [vmem:[#allocation7_spill] sm:$0xff] %v2876_v1  ;;  %v436_v3 = vsel %vm428_vm1, %v434_v55, %v435_v60  ;;  %4047 = vst [vmem:[#allocation8_spill] sm:$0xff] %v2881_v4  ;;  %v454_v5 = vrot.slane %v2876_v1, 1  ;;  %2055 = vrot.lane.b32.xlu1 %v2872_v62, %s2720_s26  ;;  %v2889_v9 = vsel %vm238_vm0, %v255_v61, %v339_v0  ;;  %v455_v10 = vrot.slane %v2881_v4, 1 }
  0x2b   : > { %v438_v8 = vsel %vm428_vm1, %v435_v60, %v437_v63  ;;  %v251_v11 = vrot.slane %v150_v57, 7  ;;  %v457_v16 = vrot.slane %v2889_v9, 1  ;;  %v252_v17 = vrot.slane %v151_v2, 7 }
  0x2c   : > { %v2892_v12 = vpack.i.bf16 %v438_v8, %v436_v3  ;;  %v338_v18 = vrot.slane %v151_v2, 5  ;;  %v456_v20 = vsel %vm428_vm1, %v454_v5, %v455_v10  ;;  %v197_v25 = vrot.slane %v156_v7, 1 }
  0x2d   : > { %v2898_v24 = vsel %vm238_vm0, %v194_v6, %v251_v11  ;;  %v260_v26 = vrot.slane %v156_v7, 7  ;;  %v458_v28 = vsel %vm428_vm1, %v455_v10, %v457_v16  ;;  %v2905_v29 = vsel %vm238_vm0, %v251_v11, %v252_v17  ;;  %v158_v7 = vld [vmem:[%s2797_s25 + $0x80] sm:$0xff] }
  0x2e   : > { %4048 = vst [vmem:[#allocation9_spill] sm:$0xff] %v2898_v24  ;;  %2045 = vrot.lane.b32.xlu0 %v2892_v12, %s2720_s26  ;;  %4049 = vst [vmem:[#allocation10_spill] sm:$0xff] %v2905_v29  ;;  %v2908_v31 = vsel %vm238_vm0, %v252_v17, %v338_v18  ;;  %v449_v33 = vrot.slane %v2898_v24, 1  ;;  %v2911_v34 = vpack.i.bf16 %v458_v28, %v456_v20  ;;  %v450_v35 = vrot.slane %v2905_v29, 1 }
  0x2f   : > { %v452_v36 = vrot.slane %v2908_v31, 1  ;;  %v261_v38 = vrot.slane %v157_v19, 7  ;;  %v341_v40 = vrot.slane %v157_v19, 5  ;;  %v2917_v42 = vsel %vm238_vm0, %v197_v25, %v260_v26  ;;  %v159_v25 = vld [vmem:[%s2797_s25 + $0x88] sm:$0xff] }
  0x30   : > { %4050 = vst [vmem:[#allocation11_spill] sm:$0xff] %v2911_v34  ;;  %v196_v43 = vrot.slane %v154_v27, 1  ;;  %v257_v46 = vrot.slane %v154_v27, 7  ;;  %2065 = vrot.lane.b32.xlu1 %v2911_v34, %s2720_s26  ;;  %v451_v48 = vsel %vm428_vm1, %v449_v33, %v450_v35  ;;  %v464_v52 = vrot.slane %v2917_v42, 1 }
  0x31   : > { %v453_v49 = vsel %vm428_vm1, %v450_v35, %v452_v36  ;;  %v2925_v50 = vsel %vm238_vm0, %v260_v26, %v261_v38  ;;  %v2931_v55 = vsel %vm238_vm0, %v261_v38, %v341_v40  ;;  %v258_v57 = vrot.slane %v155_v39, 7  ;;  %v164_v35 = vld [vmem:[%s2797_s25 + $0xb0] sm:$0xff] }
  0x32   : > { %v2928_v53 = vpack.i.bf16 %v453_v49, %v451_v48  ;;  %v465_v56 = vrot.slane %v2925_v50, 1  ;;  %v467_v60 = vrot.slane %v2931_v55, 1  ;;  %v340_v61 = vrot.slane %v155_v39, 5  ;;  %v165_v49 = vld [vmem:[%s2797_s25 + $0xb8] sm:$0xff] }
  0x33   : > { %v2937_v63 = vsel %vm238_vm0, %v196_v43, %v257_v46  ;;  %v199_v0 = vrot.slane %v160_v47, 1  ;;  %v2943_v3 = vsel %vm238_vm0, %v257_v46, %v258_v57  ;;  %v266_v6 = vrot.slane %v160_v47, 7 }
  0x34   : > { %4051 = vst [vmem:[#allocation12_spill] sm:$0xff] %v2937_v63  ;;  %2060 = vrot.lane.b32.xlu0 %v2928_v53, %s2720_s26  ;;  %v466_v2 = vsel %vm428_vm1, %v464_v52, %v465_v56  ;;  %4052 = vst [vmem:[#allocation13_spill] sm:$0xff] %v2943_v3  ;;  %v459_v5 = vrot.slane %v2937_v63, 1  ;;  %v468_v8 = vsel %vm428_vm1, %v465_v56, %v467_v60  ;;  %v460_v11 = vrot.slane %v2943_v3, 1  ;;  %v162_v60 = vld [vmem:[%s2797_s25 + $0xa0] sm:$0xff] }
  0x35   : > { %v2949_v10 = vsel %vm238_vm0, %v258_v57, %v340_v61  ;;  %v267_v16 = vrot.slane %v161_v58, 7  ;;  %v2952_v17 = vpack.i.bf16 %v468_v8, %v466_v2  ;;  %v343_v19 = vrot.slane %v161_v58, 5 }
  0x36   : > { %4053 = vst [vmem:[#allocation14_spill] sm:$0xff] %v2949_v10  ;;  %v462_v18 = vrot.slane %v2949_v10, 1  ;;  %v2956_v20 = vsel %vm238_vm0, %v199_v0, %v266_v6  ;;  %v461_v26 = vsel %vm428_vm1, %v459_v5, %v460_v11  ;;  %v198_v33 = vrot.slane %v158_v7, 1 }
  0x37   : > { %4054 = vst [vmem:[#allocation15_spill] sm:$0xff] %v2952_v17  ;;  %v2961_v27 = vsel %vm238_vm0, %v266_v6, %v267_v16  ;;  %v474_v28 = vrot.slane %v2956_v20, 1  ;;  %2075 = vrot.lane.b32.xlu1 %v2952_v17, %s2720_s26  ;;  %v2969_v38 = vsel %vm238_vm0, %v267_v16, %v343_v19  ;;  %v263_v40 = vrot.slane %v158_v7, 7  ;;  %v163_v16 = vld [vmem:[%s2797_s25 + $0xa8] sm:$0xff] }
  0x38   : > { %v463_v36 = vsel %vm428_vm1, %v460_v11, %v462_v18  ;;  %v475_v39 = vrot.slane %v2961_v27, 1  ;;  %v477_v46 = vrot.slane %v2969_v38, 1  ;;  %v264_v47 = vrot.slane %v159_v25, 7  ;;  %v167_v17 = vld [vmem:[%s2797_s25 + $0xc8] sm:$0xff] }
  0x39   : > { %v2972_v43 = vpack.i.bf16 %v463_v36, %v461_v26  ;;  %v342_v48 = vrot.slane %v159_v25, 5  ;;  %v2978_v56 = vsel %vm238_vm0, %v198_v33, %v263_v40  ;;  %v201_v57 = vrot.slane %v164_v35, 1 }
  0x3a   : > { %v476_v52 = vsel %vm428_vm1, %v474_v28, %v475_v39  ;;  %v272_v58 = vrot.slane %v164_v35, 7  ;;  %v478_v61 = vsel %vm428_vm1, %v475_v39, %v477_v46  ;;  %v2985_v0 = vsel %vm238_vm0, %v263_v40, %v264_v47  ;;  %v168_v28 = vld [vmem:[%s2797_s25 + $0xd0] sm:$0xff] }
  0x3b   : > { %4055 = vst [vmem:[#allocation16_spill] sm:$0xff] %v2972_v43  ;;  %2070 = vrot.lane.b32.xlu0 %v2972_v43, %s2720_s26  ;;  %v2988_v2 = vsel %vm238_vm0, %v264_v47, %v342_v48  ;;  %v469_v5 = vrot.slane %v2978_v56, 1  ;;  %v2991_v6 = vpack.i.bf16 %v478_v61, %v476_v52  ;;  %v470_v7 = vrot.slane %v2985_v0, 1 }
  0x3c   : > { %v472_v8 = vrot.slane %v2988_v2, 1  ;;  %v273_v11 = vrot.slane %v165_v49, 7  ;;  %v345_v18 = vrot.slane %v165_v49, 5  ;;  %v2997_v19 = vsel %vm238_vm0, %v201_v57, %v272_v58  ;;  %v169_v49 = vld [vmem:[%s2797_s25 + $0xd8] sm:$0xff] }
  0x3d   : > { %4056 = vst [vmem:[#allocation17_spill] sm:$0xff] %v2997_v19  ;;  %v200_v25 = vrot.slane %v162_v60, 1  ;;  %v269_v26 = vrot.slane %v162_v60, 7  ;;  %2085 = vrot.lane.b32.xlu1 %v2991_v6, %s2720_s26  ;;  %v471_v33 = vsel %vm428_vm1, %v469_v5, %v470_v7  ;;  %v484_v39 = vrot.slane %v2997_v19, 1 }
  0x3e   : > { %v473_v35 = vsel %vm428_vm1, %v470_v7, %v472_v8  ;;  %v3005_v36 = vsel %vm238_vm0, %v272_v58, %v273_v11  ;;  %v3011_v46 = vsel %vm238_vm0, %v273_v11, %v345_v18  ;;  %v270_v48 = vrot.slane %v163_v16, 7  ;;  %v166_v11 = vld [vmem:[%s2797_s25 + $0xc0] sm:$0xff] }
  0x3f   : > { %4057 = vst [vmem:[#allocation18_spill] sm:$0xff] %v3005_v36  ;;  %v3008_v40 = vpack.i.bf16 %v473_v35, %v471_v33  ;;  %v485_v47 = vrot.slane %v3005_v36, 1  ;;  %v487_v52 = vrot.slane %v3011_v46, 1  ;;  %v344_v57 = vrot.slane %v163_v16, 5 }
  0x40   : > { %v3017_v60 = vsel %vm238_vm0, %v200_v25, %v269_v26  ;;  %v203_v58 = vrot.slane %v168_v28, 1  ;;  %v3023_v5 = vsel %vm238_vm0, %v269_v26, %v270_v48  ;;  %v278_v8 = vrot.slane %v168_v28, 7 }
  0x41   : > { %2080 = vrot.lane.b32.xlu0 %v3008_v40, %s2720_s26  ;;  %v486_v61 = vsel %vm428_vm1, %v484_v39, %v485_v47  ;;  %v479_v7 = vrot.slane %v3017_v60, 1  ;;  %v488_v18 = vsel %vm428_vm1, %v485_v47, %v487_v52  ;;  %v3029_v16 = vsel %vm238_vm0, %v270_v48, %v344_v57 }
  0x42   : > { %v480_v25 = vrot.slane %v3023_v5, 1  ;;  %v279_v33 = vrot.slane %v169_v49, 7  ;;  %v3032_v35 = vpack.i.bf16 %v488_v18, %v486_v61  ;;  %v482_v32 = vrot.slane %v3029_v16, 1 }
  0x43   : > { %v347_v39 = vrot.slane %v169_v49, 5  ;;  %v3036_v26 = vsel %vm238_vm0, %v203_v58, %v278_v8  ;;  %v202_v48 = vrot.slane %v166_v11, 1  ;;  %v275_v58 = vrot.slane %v166_v11, 7 }
  0x44   : > { %4058 = vst [vmem:[#allocation19_spill] sm:$0xff] %v3036_v26  ;;  %v481_v28 = vsel %vm428_vm1, %v479_v7, %v480_v25  ;;  %v3041_v43 = vsel %vm238_vm0, %v278_v8, %v279_v33  ;;  %v494_v47 = vrot.slane %v3036_v26, 1  ;;  %2095 = vrot.lane.b32.xlu1 %v3032_v35, %s2720_s26  ;;  %v483_v52 = vsel %vm428_vm1, %v480_v25, %v482_v32  ;;  %v170_v25 = vld [vmem:[%s2797_s25 + $0xe0] sm:$0xff] }
  0x45   : > { %4059 = vst [vmem:[#allocation20_spill] sm:$0xff] %v3041_v43  ;;  %v3048_v49 = vsel %vm238_vm0, %v279_v33, %v347_v39  ;;  %v495_v57 = vrot.slane %v3041_v43, 1  ;;  %v3051_v61 = vpack.i.bf16 %v483_v52, %v481_v28  ;;  %v276_v8 = vrot.slane %v167_v17, 7  ;;  %v171_v33 = vld [vmem:[%s2797_s25 + $0xe8] sm:$0xff] }
  0x46   : > { %4060 = vst [vmem:[#allocation21_spill] sm:$0xff] %v3048_v49  ;;  %v497_v7 = vrot.slane %v3048_v49, 1  ;;  %v346_v18 = vrot.slane %v167_v17, 5  ;;  %v3056_v3 = vsel %vm238_vm0, %v202_v48, %v275_v58  ;;  %v505_v63 = vrot.slane %v2821_v22, 2 }
  0x47   : > { %v496_v10 = vsel %vm428_vm1, %v494_v47, %v495_v57  ;;  %4061 = vst [vmem:[#allocation22_spill] sm:$0xff] %v3056_v3  ;;  %v506_v32 = vrot.slane %v2818_v21, 2  ;;  %2090 = vrot.lane.b32.xlu0 %v3051_v61, %s2720_s26  ;;  %v3066_v39 = vsel %vm238_vm0, %v275_v58, %v276_v8  ;;  %v489_v28 = vrot.slane %v3056_v3, 1 }
  0x48   : > { %v498_v11 = vsel %vm428_vm1, %v495_v57, %v497_v7  ;;  %4062 = vst [vmem:[#allocation23_spill] sm:$0xff] %v3066_v39  ;;  %v3069_v17 = vsel %vm238_vm0, %v276_v8, %v346_v18  ;;  %v490_v48 = vrot.slane %v3066_v39, 1  ;;  %v4063_v49 = vrot.slane %v2824_v23, 2 }
  0x49   : > { %v3072_v47 = vpack.i.bf16 %v498_v11, %v496_v10  ;;  %v492_v52 = vrot.slane %v3069_v17, 1  ;;  %v507_v34 = vsel %vm504_vm2, %v505_v63, %v506_v32  ;;  %v204_v7 = vrot.slane %v170_v25, 1 }
  0x4a   : > { %v509_v57 = vsel %vm504_vm2, %v506_v32, %v4063_v49  ;;  %v281_v58 = vrot.slane %v170_v25, 7  ;;  %v282_v43 = vrot.slane %v171_v33, 7  ;;  %v491_v8 = vsel %vm428_vm1, %v489_v28, %v490_v48 }
  0x4b   : > { %2105 = vrot.lane.b32.xlu1 %v3072_v47, %s2720_s26  ;;  %v493_v10 = vsel %vm428_vm1, %v490_v48, %v492_v52  ;;  %v3084_v18 = vpack.i.bf16 %v509_v57, %v507_v34  ;;  %v348_v11 = vrot.slane %v171_v33, 5  ;;  %v541_v49 = vrot.slane %v2925_v50, 2 }
  0x4c   : > { %v3086_v26 = vpack.i.bf16 %v493_v10, %v491_v8  ;;  %v3089_v63 = vsel %vm238_vm0, %v281_v58, %v282_v43  ;;  %v3092_v23 = vsel %vm238_vm0, %v204_v7, %v281_v58  ;;  %v543_v34 = vrot.slane %v2931_v55, 2 }
  0x4d   : > { %4064 = vst [vmem:[#allocation24_spill] sm:$0xff] %v3089_v63  ;;  %4065 = vst [vmem:[#allocation25_spill] sm:$0xff] %v3092_v23  ;;  %v3096_v32 = vsel %vm238_vm0, %v282_v43, %v348_v11  ;;  %v499_v25 = vrot.slane %v3092_v23, 1  ;;  %v500_v28 = vrot.slane %v3089_v63, 1  ;;  %v545_v48 = vrot.slane %v2978_v56, 2 }
  0x4e   : > { %4066 = vst [vmem:[#allocation26_spill] sm:$0xff] %v3096_v32  ;;  %2100 = vrot.lane.b32.xlu0 %v3086_v26, %s2720_s26  ;;  %v502_v33 = vrot.slane %v3096_v32, 1  ;;  %v546_v52 = vrot.slane %v2985_v0, 2  ;;  %v510_v57 = vrot.slane %v2857_v51, 2  ;;  %v3111_v7 = vsel %vm504_vm2, %v541_v49, %v543_v34 }
  0x4f   : > { %2115 = vrot.lane.b32.xlu1 %v3084_v18, %s2721_s27  ;;  %v501_v43 = vsel %vm428_vm1, %v499_v25, %v500_v28  ;;  %v511_v55 = vrot.slane %v2863_v54, 2  ;;  %v540_v58 = vrot.slane %v2917_v42, 2  ;;  %v513_v34 = vrot.slane %v2869_v59, 2 }
  0x50   : > { %v503_v8 = vsel %vm428_vm1, %v500_v28, %v502_v33  ;;  %v547_v10 = vsel %vm504_vm2, %v545_v48, %v546_v52  ;;  %v2134_v28 = vpack.i.bf16 %v2863_v54, %v2857_v51 }
  0x51   : > { %v3117_v11 = vpack.i.bf16 %v503_v8, %v501_v43  ;;  %v2124_v32 = vpack.i.bf16 %v547_v10, %v3111_v7  ;;  %v512_v63 = vsel %vm504_vm2, %v510_v57, %v511_v55  ;;  %v3122_v23 = vsel %vm504_vm2, %v540_v58, %v541_v49 }
  0x52   : > { %v2119_v25 = vpack.i.bf16 %v3122_v23, %v512_v63  ;;  %v3135_v49 = vpack.i.bf16 %v2985_v0, %v2978_v56  ;;  %v514_v33 = vsel %vm504_vm2, %v511_v55, %v513_v34  ;;  %v553_v43 = vrot.slane %v2969_v38, 2 }
  0x53   : > { %2110 = vrot.lane.b32.xlu0 %v3117_v11, %s2720_s26  ;;  %2125 = vrot.lane.b32.xlu1 %v2124_v32, %s2721_s27  ;;  %v548_v32 = vrot.slane %v2988_v2, 2  ;;  %v2154_v59 = vpack.i.bf16 %v514_v33, %v512_v63  ;;  %v2164_v2 = vpack.i.bf16 %v2818_v21, %v2821_v22  ;;  %v550_v63 = vrot.slane %v2956_v20, 2  ;;  %s2728_s26 = smov [#allocation2]  }
  0x54   : > { %v558_v34 = vrot.slane %v3029_v16, 2  ;;  %v518_v16 = vrot.slane %v2811_v15, 2  ;;  %v2294_v15 = vpack.i.bf16 %v2845_v41, %v2838_v37 }
  0x55   : > { %v549_v48 = vsel %vm504_vm2, %v546_v52, %v548_v32  ;;  %v551_v52 = vrot.slane %v2961_v27, 2  ;;  %v2229_v32 = vpack.i.bf16 %v2805_v13, %v2808_v14 }
  0x56   : > { %v3147_v57 = vpack.i.bf16 %v549_v48, %v547_v10  ;;  %v2189_v38 = vpack.i.bf16 %v514_v33, %v549_v48  ;;  %v2224_v10 = vpack.i.bf16 %v3023_v5, %v3017_v60  ;;  %v516_v48 = vrot.slane %v2805_v13, 2 }
  0x57   : > { %2120 = vrot.lane.b32.xlu0 %v2119_v25, %s2721_s27  ;;  %2135 = vrot.lane.b32.xlu1 %v2134_v28, %s2722_s28  ;;  %v552_v55 = vsel %vm504_vm2, %v550_v63, %v551_v52  ;;  %v554_v58 = vsel %vm504_vm2, %v551_v52, %v553_v43  ;;  %v555_v25 = vrot.slane %v3017_v60, 2  ;;  %v556_v28 = vrot.slane %v3023_v5, 2 }
  0x58   : > { %v2179_v8 = vpack.i.bf16 %v554_v58, %v552_v55  ;;  %v520_v63 = vrot.slane %v2838_v37, 2  ;;  %v521_v52 = vrot.slane %v2845_v41, 2  ;;  %v523_v43 = vrot.slane %v2851_v45, 2 }
  0x59   : > { %v559_v33 = vsel %vm504_vm2, %v556_v28, %v558_v34 }
  0x5a   : > { %v522_v55 = vsel %vm504_vm2, %v520_v63, %v521_v52  ;;  %v524_v58 = vsel %vm504_vm2, %v521_v52, %v523_v43 }
  0x5b   : > { %2130 = vrot.lane.b32.xlu0 %v3135_v49, %s2722_s28  ;;  %2145 = vrot.lane.b32.xlu1 %v2892_v12, %s2723_s29  ;;  %v2159_v12 = vpack.i.bf16 %v2961_v27, %v2956_v20  ;;  %v2314_v45 = vpack.i.bf16 %v524_v58, %v522_v55 }
  0x5f   : > { %2140 = vrot.lane.b32.xlu0 %v3008_v40, %s2723_s29  ;;  %2155 = vrot.lane.b32.xlu1 %v2154_v59, %s2724_s30 }
  0x63   : > { %2150 = vrot.lane.b32.xlu0 %v3147_v57, %s2724_s30  ;;  %2165 = vrot.lane.b32.xlu1 %v2164_v2, %s2725_s3 }
  0x67   : > { %2160 = vrot.lane.b32.xlu0 %v2159_v12, %s2725_s3  ;;  %2175 = vrot.lane.b32.xlu1 %v2848_v44, %s2726_s4 }
  0x6b   : > { %2170 = vrot.lane.b32.xlu0 %v2991_v6, %s2726_s4  ;;  %2185 = vrot.lane.b32.xlu1 %v3084_v18, %s2727_s5 }
  0x6f   : > { %2180 = vrot.lane.b32.xlu0 %v2179_v8, %s2727_s5  ;;  %2195 = vrot.lane.b32.xlu1 %v2159_v12, %s2722_s28 }
  0x73   : > { %2190 = vrot.lane.b32.xlu0 %v2189_v38, %s2721_s27  ;;  %2205 = vrot.lane.b32.xlu1 %v2991_v6, %s2723_s29  ;;  %v557_v6 = vsel %vm504_vm2, %v555_v25, %v556_v28  ;;  %v563_v38 = vrot.slane %v3011_v46, 2 }
  0x74   : > { %v2244_v59 = vpack.i.bf16 %v559_v33, %v557_v6 }
  0x77   : > { %2200 = vrot.lane.b32.xlu0 %v2164_v2, %s2722_s28  ;;  %2215 = vrot.lane.b32.xlu1 %v2179_v8, %s2724_s30 }
  0x7b   : > { %2210 = vrot.lane.b32.xlu0 %v2848_v44, %s2723_s29  ;;  %2225 = vrot.lane.b32.xlu1 %v2224_v10, %s2725_s3  ;;  %v515_v44 = vrot.slane %v2808_v14, 2 }
  0x7d   : > { %v517_v2 = vsel %vm504_vm2, %v515_v44, %v516_v48 }
  0x7f   : > { %2220 = vrot.lane.b32.xlu0 %v3084_v18, %s2724_s30  ;;  %2235 = vrot.lane.b32.xlu1 %v3051_v61, %s2726_s4  ;;  %v519_v18 = vsel %vm504_vm2, %v516_v48, %v518_v16 }
  0x80   : > { %v2249_v12 = vpack.i.bf16 %v519_v18, %v517_v2  ;;  %v525_v2 = vrot.slane %v2898_v24, 2  ;;  %v526_v18 = vrot.slane %v2905_v29, 2 }
  0x82   : > { %v527_v52 = vsel %vm504_vm2, %v525_v2, %v526_v18 }
  0x83   : > { %2230 = vrot.lane.b32.xlu0 %v2229_v32, %s2725_s3  ;;  %2245 = vrot.lane.b32.xlu1 %v2244_v59, %s2727_s5 }
  0x87   : > { %2240 = vrot.lane.b32.xlu0 %v2831_v30, %s2726_s4  ;;  %2255 = vrot.lane.b32.xlu1 %v2179_v8, %s2721_s27  ;;  %v561_v8 = vrot.slane %v3005_v36, 2 }
  0x89   : > { %v564_v28 = vsel %vm504_vm2, %v561_v8, %v563_v38 }
  0x8b   : > { %2250 = vrot.lane.b32.xlu0 %v2249_v12, %s2727_s5  ;;  %2265 = vrot.lane.b32.xlu1 %v2229_v32, %s2722_s28 }
  0x8f   : > { %2260 = vrot.lane.b32.xlu0 %v2224_v10, %s2722_s28  ;;  %2275 = vrot.lane.b32.xlu1 %v2831_v30, %s2723_s29  ;;  %v2289_v30 = vpack.i.bf16 %v3005_v36, %v2997_v19 }
  0x93   : > { %2270 = vrot.lane.b32.xlu0 %v3051_v61, %s2723_s29  ;;  %2285 = vrot.lane.b32.xlu1 %v2249_v12, %s2724_s30  ;;  %v560_v61 = vrot.slane %v2997_v19, 2 }
  0x95   : > { %v562_v25 = vsel %vm504_vm2, %v560_v61, %v561_v8 }
  0x96   : > { %v3223_v10 = vpop.permute.xlu1 %2050  ;;  %v2309_v46 = vpack.i.bf16 %v564_v28, %v562_v25 }
  0x97   : > { %2280 = vrot.lane.b32.xlu0 %v2244_v59, %s2724_s30  ;;  %2295 = vrot.lane.b32.xlu1 %v2294_v15, %s2725_s3 }
  0x98   : > { %v3230_v34 = vpop.permute.xlu0 %2040 }
  0x9b   : > { %2290 = vrot.lane.b32.xlu0 %v2289_v30, %s2725_s3  ;;  %2305 = vrot.lane.b32.xlu1 %v2872_v62, %s2726_s4 }
  0x9c   : > { %v3235_v6 = vpop.permute.xlu1 %2055 }
  0x9f   : > { %2300 = vrot.lane.b32.xlu0 %v3032_v35, %s2726_s4  ;;  %2315 = vrot.lane.b32.xlu1 %v2314_v45, %s2727_s5 }
  0xa0   : > { %v3237_v33 = vpop.permute.xlu0 %2045 }
  0xa2   : > { %v3241_v32 = vpop.permute.xlu1 %2065 }
  0xa3   : > { %2310 = vrot.lane.b32.xlu0 %v2309_v46, %s2727_s5  ;;  %2325 = vrot.lane.b32.xlu1 %v2249_v12, %s2721_s27  ;;  %4067 = vst [vmem:[#allocation27_spill] sm:$0xff] %v3241_v32  ;;  %v528_v12 = vrot.slane %v2908_v31, 2  ;;  %v568_v31 = vrot.slane %v3069_v17, 2  ;;  %v2043_v32 = vunpack.i.h.bf16 %v3230_v34 }
  0xa5   : > { %v529_v43 = vsel %vm504_vm2, %v526_v18, %v528_v12 }
  0xa6   : > { %v3245_v16 = vpop.permute.xlu0 %2060  ;;  %v3280_v55 = vpack.i.bf16 %v529_v43, %v527_v52 }
  0xa7   : > { %2320 = vrot.lane.b32.xlu0 %v2244_v59, %s2721_s27  ;;  %2335 = vrot.lane.b32.xlu1 %v2294_v15, %s2722_s28  ;;  %4068 = vst [vmem:[#allocation28_spill] sm:$0xff] %v3245_v16  ;;  %v2364_v59 = vpack.i.bf16 %v2905_v29, %v2898_v24 }
  0xa9   : > { %v3250_v44 = vpop.permute.xlu1 %2075 }
  0xab   : > { %2330 = vrot.lane.b32.xlu0 %v2289_v30, %s2722_s28  ;;  %2345 = vrot.lane.b32.xlu1 %v2872_v62, %s2723_s29  ;;  %v2359_v62 = vpack.i.bf16 %v3066_v39, %v3056_v3  ;;  %v566_v30 = vrot.slane %v3066_v39, 2 }
  0xad   : > { %v3252_v48 = vpop.permute.xlu0 %2070  ;;  %v569_v8 = vsel %vm504_vm2, %v566_v30, %v568_v31  ;;  %v4074_v31 = vld [vmem:[#allocation20_spill] sm:$0xff] }
  0xae   : > { %4069 = vst [vmem:[#allocation29_spill] sm:$0xff] %v3252_v48 }
  0xaf   : > { %2340 = vrot.lane.b32.xlu0 %v3032_v35, %s2723_s29  ;;  %2355 = vrot.lane.b32.xlu1 %v2314_v45, %s2724_s30  ;;  %v3262_v15 = vpop.permute.xlu1 %2085  ;;  %v565_v35 = vrot.slane %v3056_v3, 2  ;;  %v2077_v3 = vunpack.i.l.bf16 %v3250_v44 }
  0xb1   : > { %v567_v58 = vsel %vm504_vm2, %v565_v35, %v566_v30  ;;  %v4073_v30 = vld [vmem:[#allocation19_spill] sm:$0xff] }
  0xb2   : > { %v3290_v17 = vpack.i.bf16 %v569_v8, %v567_v58  ;;  %v3329_v58 = vpack.i.bf16 %v4074_v31, %v4073_v30  ;;  %v571_v8 = vrot.slane %v4074_v31, 2 }
  0xb3   : > { %2350 = vrot.lane.b32.xlu0 %v2309_v46, %s2724_s30  ;;  %2365 = vrot.lane.b32.xlu1 %v2364_v59, %s2725_s3  ;;  %v3269_v63 = vpop.permute.xlu0 %2080 }
  0xb6   : > { %v3278_v61 = vpop.permute.xlu1 %2095 }
  0xb7   : > { %2360 = vrot.lane.b32.xlu0 %v2359_v62, %s2725_s3  ;;  %2375 = vrot.lane.b32.xlu1 %v2928_v53, %s2726_s4 }
  0xb9   : > { %v3284_v38 = vpop.permute.xlu0 %2090 }
  0xbb   : > { %2370 = vrot.lane.b32.xlu0 %v3086_v26, %s2726_s4  ;;  %2385 = vrot.lane.b32.xlu1 %v3280_v55, %s2727_s5 }
  0xbd   : > { %v3292_v25 = vpop.permute.xlu1 %2105 }
  0xbe   : > { %4070 = vst [vmem:[#allocation30_spill] sm:$0xff] %v3292_v25 }
  0xbf   : > { %2380 = vrot.lane.b32.xlu0 %v3290_v17, %s2727_s5  ;;  %2395 = vrot.lane.b32.xlu1 %v2314_v45, %s2721_s27 }
  0xc0   : > { %v3297_v28 = vpop.permute.xlu0 %2100 }
  0xc1   : > { %4071 = vst [vmem:[#allocation31_spill] sm:$0xff] %v3297_v28  ;;  %v3299_v2 = vpop.permute.xlu1 %2115 }
  0xc3   : > { %2390 = vrot.lane.b32.xlu0 %v2309_v46, %s2721_s27  ;;  %2405 = vrot.lane.b32.xlu1 %v2364_v59, %s2722_s28  ;;  %v3320_v46 = vpack.i.bf16 %v2881_v4, %v2876_v1  ;;  %v530_v59 = vrot.slane %v2876_v1, 2 }
  0xc5   : > { %v3303_v18 = vpop.permute.xlu0 %2110  ;;  %v3305_v12 = vpop.permute.xlu1 %2125 }
  0xc6   : > { %4072 = vst [vmem:[#allocation32_spill] sm:$0xff] %v3303_v18  ;;  %v4075_v18 = vld [vmem:[#allocation21_spill] sm:$0xff] }
  0xc7   : > { %2400 = vrot.lane.b32.xlu0 %v2359_v62, %s2722_s28  ;;  %2415 = vrot.lane.b32.xlu1 %v2928_v53, %s2723_s29  ;;  %v531_v62 = vrot.slane %v2881_v4, 2  ;;  %v533_v53 = vrot.slane %v2889_v9, 2  ;;  %v573_v48 = vrot.slane %v4075_v18, 2 }
  0xc9   : > { %v3310_v35 = vpop.permute.xlu0 %2120  ;;  %v3312_v45 = vpop.permute.xlu1 %2135  ;;  %v532_v9 = vsel %vm504_vm2, %v530_v59, %v531_v62  ;;  %v534_v1 = vsel %vm504_vm2, %v531_v62, %v533_v53  ;;  %v574_v25 = vsel %vm504_vm2, %v571_v8, %v573_v48  ;;  %v2042_v59 = vunpack.i.l.bf16 %v3230_v34  ;;  %v4076_v62 = vld [vmem:[#allocation11_spill] sm:$0xff] }
  0xca   : > { %v3342_v31 = vpack.i.bf16 %v534_v1, %v532_v9  ;;  %v2078_v53 = vunpack.i.h.bf16 %v3250_v44  ;;  %v2118_v1 = vunpack.i.h.bf16 %v3299_v2  ;;  %v2127_v48 = vunpack.i.l.bf16 %v3305_v12 }
  0xcb   : > { %2410 = vrot.lane.b32.xlu0 %v3086_v26, %s2723_s29  ;;  %2425 = vrot.lane.b32.xlu1 %v3280_v55, %s2724_s30  ;;  %v570_v26 = vrot.slane %v4073_v30, 2  ;;  %v2138_v24 = vunpack.i.h.bf16 %v3312_v45  ;;  %v2137_v29 = vunpack.i.l.bf16 %v3312_v45  ;;  %v1331_v16 = vsel %vm1330_vm3, %v2821_v22, %v2042_v59 }
  0xcc   : > { %v1345_v45 = vsel %vm1330_vm3, %v2917_v42, %v2077_v3 }
  0xcd   : > { %v2131_v52 = vpop.permute.xlu0 %2130  ;;  %v3325_v43 = vpop.permute.xlu1 %2145  ;;  %v572_v18 = vsel %vm504_vm2, %v570_v26, %v571_v8  ;;  %v2117_v26 = vunpack.i.l.bf16 %v3299_v2  ;;  %v2123_v8 = vunpack.i.h.bf16 %v3310_v35  ;;  %v1332_v2 = vsel %vm1330_vm3, %v2818_v21, %v2043_v32 }
  0xce   : > { %v3360_v39 = vpack.i.bf16 %v574_v25, %v572_v18  ;;  %v2133_v44 = vunpack.i.h.bf16 %v2131_v52  ;;  %v2132_v28 = vunpack.i.l.bf16 %v2131_v52  ;;  %v2148_v19 = vunpack.i.h.bf16 %v3325_v43 }
  0xcf   : > { %2420 = vrot.lane.b32.xlu0 %v3290_v17, %s2724_s30  ;;  %2435 = vrot.lane.b32.xlu1 %v3320_v46, %s2725_s3  ;;  %v2147_v36 = vunpack.i.l.bf16 %v3325_v43  ;;  %v1346_v25 = vsel %vm1330_vm3, %v2925_v50, %v2078_v53  ;;  %v3379_v21 = vsel %vm1361_vm4, %v1331_v16, %v2117_v26  ;;  %v3382_v22 = vsel %vm1361_vm4, %v1332_v2, %v2118_v1 }
  0xd0   : > { %v1377_v32 = vsel %vm1361_vm4, %v1346_v25, %v2127_v48  ;;  %v1376_v52 = vsel %vm1361_vm4, %v1345_v45, %v2123_v8  ;;  %v1394_v53 = vsel %vm1392_vm5, %v3382_v22, %v2138_v24  ;;  %v1393_v3 = vsel %vm1392_vm5, %v3379_v21, %v2137_v29 }
  0xd1   : > { %v3340_v4 = vpop.permute.xlu0 %2140  ;;  %v2156_v30 = vpop.permute.xlu1 %2155  ;;  %v1410_v16 = vsel %vm1392_vm5, %v1377_v32, %v2133_v44  ;;  %v1409_v1 = vsel %vm1392_vm5, %v1376_v52, %v2132_v28  ;;  %v1427_v26 = vsel %vm1425_vm6, %v1394_v53, %v2148_v19  ;;  %v1426_v48 = vsel %vm1425_vm6, %v1393_v3, %v2147_v36 }
  0xd2   : > { %v2158_v43 = vunpack.i.h.bf16 %v2156_v30  ;;  %v2157_v18 = vunpack.i.l.bf16 %v2156_v30  ;;  %v2143_v24 = vunpack.i.h.bf16 %v3340_v4  ;;  %v2142_v29 = vunpack.i.l.bf16 %v3340_v4 }
  0xd3   : > { %2430 = vrot.lane.b32.xlu0 %v3329_v58, %s2725_s3  ;;  %2445 = vrot.lane.b32.xlu1 %v4076_v62, %s2726_s4 }
  0xd4   : > { %v1459_v28 = vsel %vm1458_vm7, %v1426_v48, %v2157_v18  ;;  %v1460_v19 = vsel %vm1458_vm7, %v1427_v26, %v2158_v43  ;;  %v1443_v43 = vsel %vm1425_vm6, %v1410_v16, %v2143_v24 }
  0xd5   : > { %v3358_v34 = vpop.permute.xlu0 %2150  ;;  %v2166_v9 = vpop.permute.xlu1 %2165 }
  0xd6   : > { %v2168_v8 = vunpack.i.h.bf16 %v2166_v9  ;;  %v2167_v2 = vunpack.i.l.bf16 %v2166_v9  ;;  %v2153_v36 = vunpack.i.h.bf16 %v3358_v34  ;;  %v2152_v9 = vunpack.i.l.bf16 %v3358_v34 }
  0xd7   : > { %2440 = vrot.lane.b32.xlu0 %v3072_v47, %s2726_s4  ;;  %2455 = vrot.lane.b32.xlu1 %v3342_v31, %s2727_s5  ;;  %v1442_v34 = vsel %vm1425_vm6, %v1409_v1, %v2142_v29 }
  0xd8   : > { %v1492_v3 = vsel %vm1491_vm8, %v1459_v28, %v2167_v2  ;;  %v1493_v4 = vsel %vm1491_vm8, %v1460_v19, %v2168_v8  ;;  %v1475_v26 = vsel %vm1458_vm7, %v1442_v34, %v2152_v9  ;;  %v1476_v48 = vsel %vm1458_vm7, %v1443_v43, %v2153_v36  ;;  %v4084_v43 = vld [vmem:[#allocation26_spill] sm:$0xff] }
  0xd9   : > { %v2161_v59 = vpop.permute.xlu0 %2160  ;;  %v2176_v37 = vpop.permute.xlu1 %2175 }
  0xda   : > { %v2178_v30 = vunpack.i.h.bf16 %v2176_v37  ;;  %v2177_v44 = vunpack.i.l.bf16 %v2176_v37  ;;  %v2163_v32 = vunpack.i.h.bf16 %v2161_v59  ;;  %v2162_v52 = vunpack.i.l.bf16 %v2161_v59 }
  0xdb   : > { %2450 = vrot.lane.b32.xlu0 %v3360_v39, %s2727_s5  ;;  %2465 = vrot.lane.b32.xlu1 %v3280_v55, %s2721_s27 }
  0xdc   : > { %v1525_v18 = vsel %vm1524_vm9, %v1492_v3, %v2177_v44  ;;  %v1526_v59 = vsel %vm1524_vm9, %v1493_v4, %v2178_v30  ;;  %v1508_v1 = vsel %vm1491_vm8, %v1475_v26, %v2162_v52  ;;  %v1509_v16 = vsel %vm1491_vm8, %v1476_v48, %v2163_v32  ;;  %v4080_v52 = vld [vmem:[#allocation13_spill] sm:$0xff] }
  0xdd   : > { %v2171_v25 = vpop.permute.xlu0 %2170  ;;  %v2186_v45 = vpop.permute.xlu1 %2185  ;;  %v4082_v3 = vld [vmem:[#allocation25_spill] sm:$0xff] }
  0xde   : > { %v2188_v53 = vunpack.i.h.bf16 %v2186_v45  ;;  %v2187_v55 = vunpack.i.l.bf16 %v2186_v45  ;;  %v2173_v41 = vunpack.i.h.bf16 %v2171_v25  ;;  %v2172_v37 = vunpack.i.l.bf16 %v2171_v25 }
  0xdf   : > { %2460 = vrot.lane.b32.xlu0 %v3290_v17, %s2721_s27  ;;  %2475 = vrot.lane.b32.xlu1 %v3320_v46, %s2722_s28  ;;  %v575_v4 = vrot.slane %v4082_v3, 2 }
  0xe0   : > { %v1558_v17 = vsel %vm1557_vm10, %v1525_v18, %v2187_v55  ;;  %v1559_v28 = vsel %vm1557_vm10, %v1526_v59, %v2188_v53  ;;  %v1541_v24 = vsel %vm1524_vm9, %v1508_v1, %v2172_v37  ;;  %v1542_v29 = vsel %vm1524_vm9, %v1509_v16, %v2173_v41  ;;  %v4081_v41 = vld [vmem:[#allocation14_spill] sm:$0xff]  ;;  %v4083_v37 = vld [vmem:[#allocation24_spill] sm:$0xff]  ;;  %v3470_v1 = vld [vmem:[%s2797_s25 + $0xf0] sm:$0xff] }
  0xe1   : > { %v2181_v8 = vpop.permute.xlu0 %2180  ;;  %v3416_v2 = vpop.permute.xlu1 %2195  ;;  %v1947_v9 = vpack.c.bf16 %v1559_v28, %v1558_v17  ;;  %v536_v53 = vrot.slane %v4080_v52, 2  ;;  %v538_v55 = vrot.slane %v4081_v41, 2  ;;  %v576_v34 = vrot.slane %v4083_v37, 2 }
  0xe2   : > { %v2183_v46 = vunpack.i.h.bf16 %v2181_v8  ;;  %v2182_v19 = vunpack.i.l.bf16 %v2181_v8  ;;  %v578_v18 = vrot.slane %v4084_v43, 2 }
  0xe3   : > { %2470 = vrot.lane.b32.xlu0 %v3329_v58, %s2722_s28  ;;  %2485 = vrot.lane.b32.xlu1 %v4076_v62, %s2723_s29  ;;  %v4079_v62 = vld [vmem:[#allocation12_spill] sm:$0xff]  ;;  %v577_v17 = vsel %vm504_vm2, %v575_v4, %v576_v34  ;;  %v2197_v4 = vunpack.i.l.bf16 %v3416_v2 }
  0xe4   : > { %v1574_v30 = vsel %vm1557_vm10, %v1541_v24, %v2182_v19  ;;  %v1575_v44 = vsel %vm1557_vm10, %v1542_v29, %v2183_v46  ;;  %v535_v32 = vrot.slane %v4079_v62, 2  ;;  %v3454_v59 = vpack.i.bf16 %v4080_v52, %v4079_v62 }
  0xe5   : > { %v3436_v25 = vpop.permute.xlu0 %2190  ;;  %v1944_v58 = vpack.c.bf16 %v1575_v44, %v1574_v30  ;;  %v2206_v45 = vpop.permute.xlu1 %2205  ;;  %v579_v28 = vsel %vm504_vm2, %v576_v34, %v578_v18  ;;  %v2083_v46 = vunpack.i.h.bf16 %v3269_v63  ;;  %v3467_v19 = vpack.i.bf16 %v4083_v37, %v4082_v3 }
  0xe6   : > { %v537_v8 = vsel %vm504_vm2, %v535_v32, %v536_v53  ;;  %v2192_v16 = vunpack.i.l.bf16 %v3436_v25  ;;  %v2082_v29 = vunpack.i.l.bf16 %v3269_v63  ;;  %v3484_v32 = vld [vmem:[%s2797_s25 + $0xf8] sm:$0xff]  ;;  %v2048_v34 = vunpack.i.h.bf16 %v3237_v33  ;;  %s2656_s25 = scalar_lea.vmem %s3959_s21, 256 }
  0xe7   : > { %2480 = vrot.lane.b32.xlu0 %v3072_v47, %s2723_s29  ;;  %1946 = vmatprep.subr.msk.bf16.mxu0 %vm3432_vm12, %v1944_v58  ;;  %v539_v47 = vsel %vm504_vm2, %v536_v53, %v538_v55  ;;  %v2128_v58 = vunpack.i.h.bf16 %v3305_v12  ;;  %v1348_v41 = vsel %vm1330_vm3, %v2985_v0, %v2083_v46  ;;  %v2198_v55 = vunpack.i.h.bf16 %v3416_v2  ;;  %p2657_p11 = scmp.ne.s32.totalorder %s3959_s21, %s2656_s25 }
  0xe8   : > { %1949 = vmatpush3.bf16.xpose.msk.msra.mxu0 %vm3432_vm12, %v1947_v9  ;;  %2495 = vrot.lane.b32.xlu1 %v3342_v31, %s2724_s30  ;;  %v3475_v24 = vpack.i.bf16 %v539_v47, %v537_v8  ;;  %v3480_v9 = vpack.i.bf16 %v579_v28, %v577_v17  ;;  %v1379_v12 = vsel %vm1361_vm4, %v1348_v41, %v2192_v16  ;;  %v2208_v43 = vunpack.i.h.bf16 %v2206_v45  ;;  %v4085_v8 = vld [vmem:[#allocation16_spill] sm:$0xff] }
  0xe9   : > { %v3456_v26 = vpop.permute.xlu0 %2200  ;;  %v2216_v48 = vpop.permute.xlu1 %2215  ;;  %v2207_v18 = vunpack.i.l.bf16 %v2206_v45  ;;  %v1347_v0 = vsel %vm1330_vm3, %v2978_v56, %v2082_v29  ;;  %v349_v16 = vrot.slane %v3484_v32, 5  ;;  %v1412_v41 = vsel %vm1392_vm5, %v1379_v12, %v2198_v55  ;;  %p2658_p12 = pnand %p2657_p11, %p2782_p5 }
  0xea   : > { %v2218_v47 = vunpack.i.h.bf16 %v2216_v48  ;;  %v2217_v17 = vunpack.i.l.bf16 %v2216_v48  ;;  %v1378_v53 = vsel %vm1361_vm4, %v1347_v0, %v2128_v58  ;;  %v1334_v48 = vsel %vm1330_vm3, %v2863_v54, %v2048_v34 }
  0xeb   : > { %2490 = vrot.lane.b32.xlu0 %v3360_v39, %s2724_s30  ;;  %v1411_v45 = vsel %vm1392_vm5, %v1378_v53, %v2197_v4  ;;  %v2047_v46 = vunpack.i.l.bf16 %v3237_v33  ;;  %v2122_v53 = vunpack.i.l.bf16 %v3310_v35  ;;  %v2193_v55 = vunpack.i.h.bf16 %v3436_v25  ;;  %p2659_p13 = pneg %p2658_p12 }
  0xec   : > { %2505 = vrot.lane.b32.xlu1 %v3454_v59, %s2725_s3  ;;  %v1444_v58 = vsel %vm1425_vm6, %v1411_v45, %v2207_v18  ;;  %v2202_v45 = vunpack.i.l.bf16 %v3456_v26 }
  0xed   : > { %v3478_v30 = vpop.permute.xlu0 %2210  ;;  %v2226_v44 = vpop.permute.xlu1 %2225  ;;  %v1477_v4 = vsel %vm1458_vm7, %v1444_v58, %v2217_v17 }
  0xee   : > { %v2228_v63 = vunpack.i.h.bf16 %v2226_v44  ;;  %v2227_v3 = vunpack.i.l.bf16 %v2226_v44  ;;  %v1445_v44 = vsel %vm1425_vm6, %v1412_v41, %v2208_v43  ;;  %v2203_v43 = vunpack.i.h.bf16 %v3456_v26 }
  0xef   : > { %2500 = vrot.lane.b32.xlu0 %v3467_v19, %s2725_s3  ;;  %v1478_v12 = vsel %vm1458_vm7, %v1445_v44, %v2218_v47  ;;  %v2213_v47 = vunpack.i.h.bf16 %v3478_v30  ;;  %v2212_v17 = vunpack.i.l.bf16 %v3478_v30  ;;  %v1333_v26 = vsel %vm1330_vm3, %v2857_v51, %v2047_v46 }
  0xf0   : > { %2515 = vrot.lane.b32.xlu1 %v4085_v8, %s2726_s4  ;;  %v1510_v54 = vsel %vm1491_vm8, %v1477_v4, %v2227_v3  ;;  %v1511_v33 = vsel %vm1491_vm8, %v1478_v12, %v2228_v63  ;;  %v1364_v4 = vsel %vm1361_vm4, %v1333_v26, %v2122_v53  ;;  %v1365_v30 = vsel %vm1361_vm4, %v1334_v48, %v2193_v55 }
  0xf1   : > { %v2221_v2 = vpop.permute.xlu0 %2220  ;;  %v2236_v28 = vpop.permute.xlu1 %2235 }
  0xf2   : > { %v2238_v56 = vunpack.i.h.bf16 %v2236_v28  ;;  %v2237_v29 = vunpack.i.l.bf16 %v2236_v28  ;;  %v2223_v41 = vunpack.i.h.bf16 %v2221_v2 }
  0xf3   : > { %2510 = vrot.lane.b32.xlu0 %v3117_v11, %s2726_s4 }
  0xf4   : > { %2525 = vrot.lane.b32.xlu1 %v3475_v24, %s2727_s5  ;;  %v1543_v35 = vsel %vm1524_vm9, %v1510_v54, %v2237_v29  ;;  %v1544_v25 = vsel %vm1524_vm9, %v1511_v33, %v2238_v56  ;;  %v2222_v29 = vunpack.i.l.bf16 %v2221_v2  ;;  %v1395_v54 = vsel %vm1392_vm5, %v1364_v4, %v2202_v45 }
  0xf5   : > { %v2231_v0 = vpop.permute.xlu0 %2230  ;;  %v2246_v28 = vpop.permute.xlu1 %2245  ;;  %v1396_v33 = vsel %vm1392_vm5, %v1365_v30, %v2203_v43  ;;  %v1428_v51 = vsel %vm1425_vm6, %v1395_v54, %v2212_v17 }
  0xf6   : > { %v2248_v34 = vunpack.i.h.bf16 %v2246_v28  ;;  %v2247_v18 = vunpack.i.l.bf16 %v2246_v28  ;;  %v2233_v12 = vunpack.i.h.bf16 %v2231_v0  ;;  %v2232_v28 = vunpack.i.l.bf16 %v2231_v0 }
  0xf7   : > { %2520 = vrot.lane.b32.xlu0 %v3480_v9, %s2727_s5  ;;  %v1429_v2 = vsel %vm1425_vm6, %v1396_v33, %v2213_v47  ;;  %v1461_v46 = vsel %vm1458_vm7, %v1428_v51, %v2222_v29  ;;  %v4086_v0 = vrot.slane %v3484_v32, 7  ;;  %v3585_v32 = vpack.i.bf16 %v2925_v50, %v2917_v42 }
  0xf8   : > { %v1576_v3 = vsel %vm1557_vm10, %v1543_v35, %v2247_v18  ;;  %v1577_v63 = vsel %vm1557_vm10, %v1544_v25, %v2248_v34  ;;  %2535 = vrot.lane.b32.xlu1 %v3342_v31, %s2721_s27  ;;  %v1462_v48 = vsel %vm1458_vm7, %v1429_v2, %v2223_v41  ;;  %v1494_v43 = vsel %vm1491_vm8, %v1461_v46, %v2232_v28 }
  0xf9   : > { %v1950_v56 = vpack.c.bf16 %v1577_v63, %v1576_v3  ;;  %v2241_v58 = vpop.permute.xlu0 %2240  ;;  %v3534_v44 = vpop.permute.xlu1 %2255  ;;  %v1495_v45 = vsel %vm1491_vm8, %v1462_v48, %v2233_v12  ;;  %v4089_v3 = vrot.slane %v3470_v1, 1  ;;  %v4090_v26 = vmov %v4086_v0 }
  0xfa   : > { %v2243_v31 = vunpack.i.h.bf16 %v2241_v58  ;;  %v2242_v34 = vunpack.i.l.bf16 %v2241_v58  ;;  %v397_v41 = vsel %vm238_vm0, %v4090_v26, %v349_v16  ;;  %v2088_v51 = vunpack.i.h.bf16 %v3262_v15 }
  0xfb   : > { %2530 = vrot.lane.b32.xlu0 %v3360_v39, %s2721_s27  ;;  %1952 = vmatprep.subr.msk.bf16.mxu0 %vm3432_vm12, %v1950_v56  ;;  %v4087_v39 = vrot.slane %v3470_v1, 7  ;;  %v585_v12 = vrot.slane %v397_v41, 1  ;;  %v590_v28 = vrot.slane %v397_v41, 2  ;;  %v2087_v42 = vunpack.i.l.bf16 %v3262_v15 }
  0xfc   : > { %2545 = vrot.lane.b32.xlu1 %v3454_v59, %s2722_s28  ;;  %v1527_v59 = vsel %vm1524_vm9, %v1494_v43, %v2242_v34  ;;  %v1528_v47 = vsel %vm1524_vm9, %v1495_v45, %v2243_v31  ;;  %v2258_v46 = vunpack.i.h.bf16 %v3534_v44  ;;  %v2257_v48 = vunpack.i.l.bf16 %v3534_v44 }
  0xfd   : > { %v2251_v53 = vpop.permute.xlu0 %2250  ;;  %v3550_v55 = vpop.permute.xlu1 %2265  ;;  %v286_v18 = vsel %vm238_vm0, %v4087_v39, %v4086_v0  ;;  %v4088_v17 = vmov %v4087_v39 }
  0xfe   : > { %v2253_v35 = vunpack.i.h.bf16 %v2251_v53  ;;  %v2252_v25 = vunpack.i.l.bf16 %v2251_v53  ;;  %v381_v63 = vsel %vm238_vm0, %v4089_v3, %v4088_v17  ;;  %v583_v1 = vrot.slane %v286_v18, 1 }
  0xff   : > { %2540 = vrot.lane.b32.xlu0 %v3467_v19, %s2722_s28  ;;  %v582_v30 = vrot.slane %v381_v63, 1  ;;  %v588_v16 = vrot.slane %v286_v18, 2  ;;  %v3593_v34 = vpack.i.bf16 %v286_v18, %v381_v63  ;;  %v3607_v18 = vpack.i.bf16 %v3111_v7, %v3122_v23  ;;  %v4091_v7 = vld [vmem:[#allocation15_spill] sm:$0xff] }
 0x100   : > { %v1560_v29 = vsel %vm1557_vm10, %v1527_v59, %v2252_v25  ;;  %v1561_v56 = vsel %vm1557_vm10, %v1528_v47, %v2253_v35  ;;  %2555 = vrot.lane.b32.xlu1 %v4085_v8, %s2723_s29  ;;  %v587_v8 = vrot.slane %v381_v63, 2  ;;  %v2268_v15 = vunpack.i.h.bf16 %v3550_v55 }
 0x101   : > { %v1953_v19 = vpack.c.bf16 %v1561_v56, %v1560_v29  ;;  %v2261_v58 = vpop.permute.xlu0 %2260  ;;  %v2276_v4 = vpop.permute.xlu1 %2275  ;;  %v584_v31 = vsel %vm428_vm1, %v582_v30, %v583_v1  ;;  %v591_v2 = vsel %vm504_vm2, %v588_v16, %v590_v28  ;;  %v2267_v43 = vunpack.i.l.bf16 %v3550_v55 }
 0x102   : > { %v589_v50 = vsel %vm504_vm2, %v587_v8, %v588_v16  ;;  %v2263_v45 = vunpack.i.h.bf16 %v2261_v58  ;;  %v2262_v35 = vunpack.i.l.bf16 %v2261_v58  ;;  %v2278_v25 = vunpack.i.h.bf16 %v2276_v4 }
 0x103   : > { %2550 = vrot.lane.b32.xlu0 %v3117_v11, %s2723_s29  ;;  %1955 = vmatpush3.bf16.xpose.msk.msra.mxu0 %vm3432_vm12, %v1953_v19  ;;  %v586_v11 = vsel %vm428_vm1, %v583_v1, %v585_v12  ;;  %v2277_v59 = vunpack.i.l.bf16 %v2276_v4  ;;  %v3613_v44 = vpack.i.bf16 %v591_v2, %v589_v50  ;;  %v1350_v47 = vsel %vm1330_vm3, %v2961_v27, %v2088_v51 }
 0x104   : > { %2565 = vrot.lane.b32.xlu1 %v3475_v24, %s2724_s30  ;;  %v3603_v39 = vpack.i.bf16 %v586_v11, %v584_v31  ;;  %v1349_v23 = vsel %vm1330_vm3, %v2956_v20, %v2087_v42  ;;  %v1381_v55 = vsel %vm1361_vm4, %v1350_v47, %v2258_v46  ;;  %v1398_v29 = vsel %vm1392_vm5, %v3382_v22, %v2268_v15 }
 0x105   : > { %v3587_v54 = vpop.permute.xlu0 %2270  ;;  %v2286_v33 = vpop.permute.xlu1 %2285  ;;  %v1380_v17 = vsel %vm1361_vm4, %v1349_v23, %v2257_v48  ;;  %v1397_v27 = vsel %vm1392_vm5, %v3379_v21, %v2267_v43  ;;  %v1414_v56 = vsel %vm1392_vm5, %v1381_v55, %v2263_v45  ;;  %v1431_v58 = vsel %vm1425_vm6, %v1398_v29, %v2278_v25 }
 0x106   : > { %v2288_v3 = vunpack.i.h.bf16 %v2286_v33  ;;  %v2287_v63 = vunpack.i.l.bf16 %v2286_v33  ;;  %v1413_v20 = vsel %vm1392_vm5, %v1380_v17, %v2262_v35  ;;  %v1430_v19 = vsel %vm1425_vm6, %v1397_v27, %v2277_v59 }
 0x107   : > { %2560 = vrot.lane.b32.xlu0 %v3480_v9, %s2724_s30  ;;  %v2273_v1 = vunpack.i.h.bf16 %v3587_v54  ;;  %v2272_v22 = vunpack.i.l.bf16 %v3587_v54 }
 0x108   : > { %2575 = vrot.lane.b32.xlu1 %v3585_v32, %s2725_s3  ;;  %v1463_v21 = vsel %vm1458_vm7, %v1430_v19, %v2287_v63  ;;  %v1464_v16 = vsel %vm1458_vm7, %v1431_v58, %v2288_v3 }
 0x109   : > { %v2281_v53 = vpop.permute.xlu0 %2280  ;;  %v2296_v0 = vpop.permute.xlu1 %2295  ;;  %v1446_v15 = vsel %vm1425_vm6, %v1413_v20, %v2272_v22  ;;  %v1447_v43 = vsel %vm1425_vm6, %v1414_v56, %v2273_v1  ;;  %v2052_v1 = vunpack.i.l.bf16 %v3223_v10  ;;  %v2092_v22 = vunpack.i.l.bf16 %v3284_v38 }
 0x10a   : > { %v2298_v4 = vunpack.i.h.bf16 %v2296_v0  ;;  %v2297_v30 = vunpack.i.l.bf16 %v2296_v0  ;;  %v2283_v28 = vunpack.i.h.bf16 %v2281_v53  ;;  %v2282_v33 = vunpack.i.l.bf16 %v2281_v53 }
 0x10b   : > { %2570 = vrot.lane.b32.xlu0 %v3593_v34, %s2725_s3 }
 0x10c   : > { %2585 = vrot.lane.b32.xlu1 %v4091_v7, %s2726_s4  ;;  %v1496_v46 = vsel %vm1491_vm8, %v1463_v21, %v2297_v30  ;;  %v1497_v54 = vsel %vm1491_vm8, %v1464_v16, %v2298_v4  ;;  %v1479_v35 = vsel %vm1458_vm7, %v1446_v15, %v2282_v33  ;;  %v1480_v25 = vsel %vm1458_vm7, %v1447_v43, %v2283_v28 }
 0x10d   : > { %v2291_v26 = vpop.permute.xlu0 %2290  ;;  %v2306_v41 = vpop.permute.xlu1 %2305 }
 0x10e   : > { %v2308_v12 = vunpack.i.h.bf16 %v2306_v41  ;;  %v2307_v8 = vunpack.i.l.bf16 %v2306_v41  ;;  %v2293_v51 = vunpack.i.h.bf16 %v2291_v26  ;;  %v2292_v42 = vunpack.i.l.bf16 %v2291_v26 }
 0x10f   : > { %2580 = vrot.lane.b32.xlu0 %v3603_v39, %s2726_s4 }
 0x110   : > { %2595 = vrot.lane.b32.xlu1 %v3607_v18, %s2727_s5  ;;  %v1529_v53 = vsel %vm1524_vm9, %v1496_v46, %v2307_v8  ;;  %v1530_v45 = vsel %vm1524_vm9, %v1497_v54, %v2308_v12  ;;  %v1512_v17 = vsel %vm1491_vm8, %v1479_v35, %v2292_v42  ;;  %v1513_v3 = vsel %vm1491_vm8, %v1480_v25, %v2293_v51 }
 0x111   : > { %v2301_v31 = vpop.permute.xlu0 %2300  ;;  %v2316_v11 = vpop.permute.xlu1 %2315 }
 0x112   : > { %v2318_v50 = vunpack.i.h.bf16 %v2316_v11  ;;  %v2317_v2 = vunpack.i.l.bf16 %v2316_v11  ;;  %v2303_v48 = vunpack.i.h.bf16 %v2301_v31  ;;  %v2302_v0 = vunpack.i.l.bf16 %v2301_v31 }
 0x113   : > { %2590 = vrot.lane.b32.xlu0 %v3613_v44, %s2727_s5 }
 0x114   : > { %2605 = vrot.lane.b32.xlu1 %v3475_v24, %s2721_s27  ;;  %v1562_v59 = vsel %vm1557_vm10, %v1529_v53, %v2317_v2  ;;  %v1563_v47 = vsel %vm1557_vm10, %v1530_v45, %v2318_v50  ;;  %v1545_v41 = vsel %vm1524_vm9, %v1512_v17, %v2302_v0  ;;  %v1546_v24 = vsel %vm1524_vm9, %v1513_v3, %v2303_v48 }
 0x115   : > { %v2311_v23 = vpop.permute.xlu0 %2310  ;;  %v2326_v55 = vpop.permute.xlu1 %2325  ;;  %v1959_v29 = vpack.c.bf16 %v1563_v47, %v1562_v59  ;;  %v1351_v50 = vsel %vm1330_vm3, %v3017_v60, %v2092_v22 }
 0x116   : > { %v2313_v63 = vunpack.i.h.bf16 %v2311_v23  ;;  %v2312_v26 = vunpack.i.l.bf16 %v2311_v23  ;;  %v2328_v12 = vunpack.i.h.bf16 %v2326_v55  ;;  %v2327_v8 = vunpack.i.l.bf16 %v2326_v55 }
 0x117   : > { %2600 = vrot.lane.b32.xlu0 %v3480_v9, %s2721_s27  ;;  %s2660_s27 = sshll.u32 %s2728_s26, 4  ;;  %s2661_s27 = int_to_ptr.vmem [resolvable:$false] %s2660_s27 }
 0x118   : > { %v1578_v27 = vsel %vm1557_vm10, %v1545_v41, %v2312_v26  ;;  %v1579_v56 = vsel %vm1557_vm10, %v1546_v24, %v2313_v63  ;;  %2615 = vrot.lane.b32.xlu1 %v3585_v32, %s2722_s28  ;;  %v2053_v32 = vunpack.i.h.bf16 %v3223_v10  ;;  %p2663_p0 = scmp.lt.s32.totalorder %s3959_s21, %s2661_s27 }
 0x119   : > { %v1956_v20 = vpack.c.bf16 %v1579_v56, %v1578_v27  ;;  %v2321_v19 = vpop.permute.xlu0 %2320  ;;  %v2336_v58 = vpop.permute.xlu1 %2335 }
 0x11a   : > { %v1336_v10 = vsel %vm1330_vm3, %v2805_v13, %v2053_v32  ;;  %v2322_v21 = vunpack.i.l.bf16 %v2321_v19  ;;  %v2338_v28 = vunpack.i.h.bf16 %v2336_v58  ;;  %v2337_v33 = vunpack.i.l.bf16 %v2336_v58 }
 0x11b   : > { %2610 = vrot.lane.b32.xlu0 %v3593_v34, %s2722_s28  ;;  %1958 = vmatprep.subr.msk.bf16.mxu0 %vm3432_vm12, %v1956_v20  ;;  %s2662_s28 = scalar_lea.vmem %s2661_s27, 512 }
 0x11c   : > { %1961 = vmatpush3.bf16.xpose.msk.msra.mxu0 %vm3432_vm12, %v1959_v29  ;;  %2625 = vrot.lane.b32.xlu1 %v4091_v7, %s2723_s29  ;;  %v3684_v7 = vld [vmem:[%s4000_s1] sm:$0xff]  ;;  %v1382_v46 = vsel %vm1361_vm4, %v1351_v50, %v2322_v21  ;;  %p2664_p1 = scmp.lt.s32.totalorder %s2662_s28, %s2656_s25 }
 0x11d   : > { %v2331_v9 = vpop.permute.xlu0 %2330  ;;  %v2346_v4 = vpop.permute.xlu1 %2345  ;;  %1942 = vmatprep.mubr.msk.f32.mxu0 %vm1591_vm11, %v3684_v7 }
 0x11e   : > { %v2333_v31 = vunpack.i.h.bf16 %v2331_v9  ;;  %v2332_v11 = vunpack.i.l.bf16 %v2331_v9  ;;  %v2348_v51 = vunpack.i.h.bf16 %v2346_v4  ;;  %v2347_v42 = vunpack.i.l.bf16 %v2346_v4  ;;  %p2665_p2 = por %p2664_p1, %p2663_p0 }
 0x11f   : > { %2620 = vrot.lane.b32.xlu0 %v3603_v39, %s2723_s29  ;;  %v2093_v39 = vunpack.i.h.bf16 %v3284_v38  ;;  %v1335_v38 = vsel %vm1330_vm3, %v2808_v14, %v2052_v1 }
 0x120   : > { %2635 = vrot.lane.b32.xlu1 %v3607_v18, %s2724_s30  ;;  %v2323_v18 = vunpack.i.h.bf16 %v2321_v19  ;;  %v1366_v2 = vsel %vm1361_vm4, %v1335_v38, %v2327_v8  ;;  %p2666_p3 = pnand %p2665_p2, %p2659_p13 }
 0x121   : > { %v3674_v30 = vpop.permute.xlu0 %2340  ;;  %v2356_v34 = vpop.permute.xlu1 %2355  ;;  %v1352_v13 = vsel %vm1330_vm3, %v3023_v5, %v2093_v39  ;;  %v1415_v5 = vsel %vm1392_vm5, %v1382_v46, %v2332_v11 }
 0x122   : > { %v1383_v54 = vsel %vm1361_vm4, %v1352_v13, %v2323_v18  ;;  %v2358_v14 = vunpack.i.h.bf16 %v2356_v34  ;;  %v2357_v48 = vunpack.i.l.bf16 %v2356_v34  ;;  %v2343_v59 = vunpack.i.h.bf16 %v3674_v30 }
 0x123   : > { %2630 = vrot.lane.b32.xlu0 %v3613_v44, %s2724_s30  ;;  %v1416_v60 = vsel %vm1392_vm5, %v1383_v54, %v2333_v31  ;;  %v2342_v47 = vunpack.i.l.bf16 %v3674_v30  ;;  %v2058_v54 = vunpack.i.h.bf16 %v3235_v6 }
 0x124   : > { %2645 = vrot.lane.b32.xlu1 %v3008_v40, %s2726_s4  ;;  %v1367_v40 = vsel %vm1361_vm4, %v1336_v10, %v2328_v12  ;;  %v1449_v32 = vsel %vm1425_vm6, %v1416_v60, %v2343_v59 }
 0x125   : > { %v2351_v44 = vpop.permute.xlu0 %2350  ;;  %v2366_v16 = vpop.permute.xlu1 %2365  ;;  %v1400_v43 = vsel %vm1392_vm5, %v1367_v40, %v2338_v28  ;;  %v1448_v4 = vsel %vm1425_vm6, %v1415_v5, %v2342_v47  ;;  %v4092_v47 = vld [vmem:[#allocation6_spill] sm:$0xff] }
 0x126   : > { %v1433_v45 = vsel %vm1425_vm6, %v1400_v43, %v2348_v51  ;;  %v2368_v35 = vunpack.i.h.bf16 %v2366_v16  ;;  %v2367_v25 = vunpack.i.l.bf16 %v2366_v16  ;;  %v2353_v63 = vunpack.i.h.bf16 %v2351_v44 }
 0x127   : > { %2640 = vrot.lane.b32.xlu0 %v3135_v49, %s2725_s3  ;;  %v1399_v49 = vsel %vm1392_vm5, %v1366_v2, %v2337_v33  ;;  %v1466_v3 = vsel %vm1458_vm7, %v1433_v45, %v2358_v14  ;;  %v2352_v26 = vunpack.i.l.bf16 %v2351_v44  ;;  %v2057_v14 = vunpack.i.l.bf16 %v3235_v6 }
 0x128   : > { %v1432_v53 = vsel %vm1425_vm6, %v1399_v49, %v2347_v42  ;;  %v1499_v19 = vsel %vm1491_vm8, %v1466_v3, %v2368_v35  ;;  %v1482_v39 = vsel %vm1458_vm7, %v1449_v32, %v2353_v63  ;;  %v4094_v63 = vld [vmem:[#allocation18_spill] sm:$0xff] }
 0x129   : > { %v2361_v0 = vpop.permute.xlu0 %2360  ;;  %v2376_v15 = vpop.permute.xlu1 %2375  ;;  %v1465_v17 = vsel %vm1458_vm7, %v1432_v53, %v2357_v48  ;;  %v1481_v1 = vsel %vm1458_vm7, %v1448_v4, %v2352_v26  ;;  %v2098_v48 = vunpack.i.h.bf16 %v3278_v61  ;;  %v4095_v26 = vld [vmem:[#allocation17_spill] sm:$0xff] }
 0x12a   : > { %v2378_v23 = vunpack.i.h.bf16 %v2376_v15  ;;  %v2377_v55 = vunpack.i.l.bf16 %v2376_v15  ;;  %v2363_v29 = vunpack.i.h.bf16 %v2361_v0  ;;  %v2362_v27 = vunpack.i.l.bf16 %v2361_v0 }
 0x12b   : > { %2650 = vrot.lane.b32.xlu0 %v3147_v57, %s2727_s5  ;;  %v1498_v57 = vsel %vm1491_vm8, %v1465_v17, %v2367_v25  ;;  %v2097_v0 = vunpack.i.l.bf16 %v3278_v61  ;;  %v1354_v61 = vsel %vm1330_vm3, %v4094_v63, %v2098_v48 }
 0x12c   : > { %v1531_v30 = vsel %vm1524_vm9, %v1498_v57, %v2377_v55  ;;  %v1532_v34 = vsel %vm1524_vm9, %v1499_v19, %v2378_v23  ;;  %v1514_v18 = vsel %vm1491_vm8, %v1481_v1, %v2362_v27  ;;  %v1515_v21 = vsel %vm1491_vm8, %v1482_v39, %v2363_v29  ;;  %v4093_v55 = vld [vmem:[#allocation5_spill] sm:$0xff] }
 0x12d   : > { %v2371_v41 = vpop.permute.xlu0 %2370  ;;  %v2386_v24 = vpop.permute.xlu1 %2385  ;;  %v1338_v23 = vsel %vm1330_vm3, %v4092_v47, %v2058_v54  ;;  %v1337_v6 = vsel %vm1330_vm3, %v4093_v55, %v2057_v14 }
 0x12e   : > { %v2388_v56 = vunpack.i.h.bf16 %v2386_v24  ;;  %v2387_v20 = vunpack.i.l.bf16 %v2386_v24  ;;  %v2373_v58 = vunpack.i.h.bf16 %v2371_v41  ;;  %v2372_v9 = vunpack.i.l.bf16 %v2371_v41 }
 0x12f   : > { %v1353_v41 = vsel %vm1330_vm3, %v4095_v26, %v2097_v0 }
 0x130   : > { %v1564_v22 = vsel %vm1557_vm10, %v1531_v30, %v2387_v20  ;;  %v1565_v12 = vsel %vm1557_vm10, %v1532_v34, %v2388_v56  ;;  %v1547_v28 = vsel %vm1524_vm9, %v1514_v18, %v2372_v9  ;;  %v1548_v33 = vsel %vm1524_vm9, %v1515_v21, %v2373_v58 }
 0x131   : > { %v2381_v8 = vpop.permute.xlu0 %2380  ;;  %v2396_v10 = vpop.permute.xlu1 %2395  ;;  %v1965_v31 = vpack.c.bf16 %v1565_v12, %v1564_v22 }
 0x132   : > { %v2383_v44 = vunpack.i.h.bf16 %v2381_v8  ;;  %v2382_v16 = vunpack.i.l.bf16 %v2381_v8  ;;  %v2398_v15 = vunpack.i.h.bf16 %v2396_v10  ;;  %v2397_v49 = vunpack.i.l.bf16 %v2396_v10 }
 0x134   : > { %v1580_v11 = vsel %vm1557_vm10, %v1547_v28, %v2382_v16  ;;  %v1581_v38 = vsel %vm1557_vm10, %v1548_v33, %v2383_v44  ;;  %v1369_v24 = vsel %vm1361_vm4, %v1338_v23, %v2398_v15  ;;  %v1368_v29 = vsel %vm1361_vm4, %v1337_v6, %v2397_v49 }
 0x135   : > { %v1962_v51 = vpack.c.bf16 %v1581_v38, %v1580_v11  ;;  %v2391_v42 = vpop.permute.xlu0 %2390  ;;  %v2406_v13 = vpop.permute.xlu1 %2405 }
 0x136   : > { %v2393_v43 = vunpack.i.h.bf16 %v2391_v42  ;;  %v2392_v5 = vunpack.i.l.bf16 %v2391_v42  ;;  %v2408_v45 = vunpack.i.h.bf16 %v2406_v13  ;;  %v2407_v35 = vunpack.i.l.bf16 %v2406_v13 }
 0x137   : > { %1964 = vmatprep.subr.msk.bf16.mxu0 %vm3432_vm12, %v1962_v51 }
 0x138   : > { %1967 = vmatpush3.bf16.xpose.msk.msra.mxu0 %vm3432_vm12, %v1965_v31  ;;  %v1385_v27 = vsel %vm1361_vm4, %v1354_v61, %v2393_v43  ;;  %v1384_v56 = vsel %vm1361_vm4, %v1353_v41, %v2392_v5  ;;  %v1401_v9 = vsel %vm1392_vm5, %v1368_v29, %v2407_v35  ;;  %v1402_v4 = vsel %vm1392_vm5, %v1369_v24, %v2408_v45  ;;  %v4096_v24 = vld [vmem:[#allocation28_spill] sm:$0xff] }
 0x139   : > { %v2401_v50 = vpop.permute.xlu0 %2400  ;;  %v2416_v40 = vpop.permute.xlu1 %2415  ;;  %v2063_v29 = vunpack.i.h.bf16 %v4096_v24 }
 0x13a   : > { %v2403_v25 = vunpack.i.h.bf16 %v2401_v50  ;;  %v2402_v59 = vunpack.i.l.bf16 %v2401_v50  ;;  %v2418_v17 = vunpack.i.h.bf16 %v2416_v40  ;;  %v2417_v3 = vunpack.i.l.bf16 %v2416_v40 }
 0x13c   : > { %v1417_v32 = vsel %vm1392_vm5, %v1384_v56, %v2402_v59  ;;  %v1418_v30 = vsel %vm1392_vm5, %v1385_v27, %v2403_v25  ;;  %v1434_v34 = vsel %vm1425_vm6, %v1401_v9, %v2417_v3  ;;  %v1435_v1 = vsel %vm1425_vm6, %v1402_v4, %v2418_v17 }
 0x13d   : > { %v2411_v2 = vpop.permute.xlu0 %2410  ;;  %v2426_v46 = vpop.permute.xlu1 %2425  ;;  %v2062_v27 = vunpack.i.l.bf16 %v4096_v24 }
 0x13e   : > { %v2428_v20 = vunpack.i.h.bf16 %v2426_v46  ;;  %v2427_v57 = vunpack.i.l.bf16 %v2426_v46  ;;  %v2413_v12 = vunpack.i.h.bf16 %v2411_v2  ;;  %v2412_v8 = vunpack.i.l.bf16 %v2411_v2 }
 0x140   : > { %v1467_v21 = vsel %vm1458_vm7, %v1434_v34, %v2427_v57  ;;  %v1468_v44 = vsel %vm1458_vm7, %v1435_v1, %v2428_v20  ;;  %v1450_v46 = vsel %vm1425_vm6, %v1417_v32, %v2412_v8  ;;  %v1451_v54 = vsel %vm1425_vm6, %v1418_v30, %v2413_v12  ;;  %v4097_v20 = vld [vmem:[#allocation31_spill] sm:$0xff]  ;;  %v4098_v34 = vld [vmem:[#allocation10_spill] sm:$0xff] }
 0x141   : > { %v2421_v60 = vpop.permute.xlu0 %2420  ;;  %v2436_v53 = vpop.permute.xlu1 %2435  ;;  %v2103_v57 = vunpack.i.h.bf16 %v4097_v20  ;;  %v1340_v1 = vsel %vm1330_vm3, %v4098_v34, %v2063_v29 }
 0x142   : > { %v2438_v39 = vunpack.i.h.bf16 %v2436_v53  ;;  %v2437_v22 = vunpack.i.l.bf16 %v2436_v53  ;;  %v2423_v16 = vunpack.i.h.bf16 %v2421_v60  ;;  %v2422_v28 = vunpack.i.l.bf16 %v2421_v60 }
 0x144   : > { %v1500_v13 = vsel %vm1491_vm8, %v1467_v21, %v2437_v22  ;;  %v1501_v50 = vsel %vm1491_vm8, %v1468_v44, %v2438_v39  ;;  %v1483_v0 = vsel %vm1458_vm7, %v1450_v46, %v2422_v28  ;;  %v1484_v15 = vsel %vm1458_vm7, %v1451_v54, %v2423_v16  ;;  %v4099_v39 = vld [vmem:[#allocation9_spill] sm:$0xff]  ;;  %v4100_v28 = vld [vmem:[#allocation23_spill] sm:$0xff] }
 0x145   : > { %v2431_v19 = vpop.permute.xlu0 %2430  ;;  %v2446_v58 = vpop.permute.xlu1 %2445  ;;  %v1339_v22 = vsel %vm1330_vm3, %v4099_v39, %v2062_v27 }
 0x146   : > { %v2448_v10 = vunpack.i.h.bf16 %v2446_v58  ;;  %v2447_v18 = vunpack.i.l.bf16 %v2446_v58  ;;  %v2433_v11 = vunpack.i.h.bf16 %v2431_v19  ;;  %v2432_v38 = vunpack.i.l.bf16 %v2431_v19 }
 0x147   : > { %v2102_v19 = vunpack.i.l.bf16 %v4097_v20 }
 0x148   : > { %v1533_v14 = vsel %vm1524_vm9, %v1500_v13, %v2447_v18  ;;  %v1534_v48 = vsel %vm1524_vm9, %v1501_v50, %v2448_v10  ;;  %v1516_v53 = vsel %vm1491_vm8, %v1483_v0, %v2432_v38  ;;  %v1517_v45 = vsel %vm1491_vm8, %v1484_v15, %v2433_v11 }
 0x149   : > { %v2441_v33 = vpop.permute.xlu0 %2440  ;;  %v2456_v31 = vpop.permute.xlu1 %2455 }
 0x14a   : > { %v2458_v51 = vunpack.i.h.bf16 %v2456_v31  ;;  %v2457_v42 = vunpack.i.l.bf16 %v2456_v31  ;;  %v2443_v40 = vunpack.i.h.bf16 %v2441_v33  ;;  %v2442_v2 = vunpack.i.l.bf16 %v2441_v33  ;;  %v4101_v31 = vld [vmem:[#allocation22_spill] sm:$0xff] }
 0x14b   : > { %v1356_v33 = vsel %vm1330_vm3, %v4100_v28, %v2103_v57  ;;  %v1355_v11 = vsel %vm1330_vm3, %v4101_v31, %v2102_v19 }
 0x14c   : > { %v1566_v49 = vsel %vm1557_vm10, %v1533_v14, %v2457_v42  ;;  %v1567_v43 = vsel %vm1557_vm10, %v1534_v48, %v2458_v51  ;;  %v1549_v59 = vsel %vm1524_vm9, %v1516_v53, %v2442_v2  ;;  %v1550_v47 = vsel %vm1524_vm9, %v1517_v45, %v2443_v40 }
 0x14d   : > { %v2451_v5 = vpop.permute.xlu0 %2450  ;;  %v2466_v60 = vpop.permute.xlu1 %2465  ;;  %v1971_v23 = vpack.c.bf16 %v1567_v43, %v1566_v49 }
 0x14e   : > { %v2453_v35 = vunpack.i.h.bf16 %v2451_v5  ;;  %v2452_v25 = vunpack.i.l.bf16 %v2451_v5  ;;  %v2468_v58 = vunpack.i.h.bf16 %v2466_v60  ;;  %v2467_v9 = vunpack.i.l.bf16 %v2466_v60 }
 0x150   : > { %v1582_v55 = vsel %vm1557_vm10, %v1549_v59, %v2452_v25  ;;  %v1583_v6 = vsel %vm1557_vm10, %v1550_v47, %v2453_v35  ;;  %v1370_v38 = vsel %vm1361_vm4, %v1339_v22, %v2467_v9  ;;  %v1371_v51 = vsel %vm1361_vm4, %v1340_v1, %v2468_v58 }
 0x151   : > { %v1968_v17 = vpack.c.bf16 %v1583_v6, %v1582_v55  ;;  %v2461_v3 = vpop.permute.xlu0 %2460  ;;  %v2476_v63 = vpop.permute.xlu1 %2475 }
 0x152   : > { %v2463_v4 = vunpack.i.h.bf16 %v2461_v3  ;;  %v2462_v32 = vunpack.i.l.bf16 %v2461_v3  ;;  %v2478_v12 = vunpack.i.h.bf16 %v2476_v63  ;;  %v2477_v8 = vunpack.i.l.bf16 %v2476_v63 }
 0x153   : > { %1970 = vmatprep.subr.msk.bf16.mxu0 %vm3432_vm12, %v1968_v17 }
 0x154   : > { %1973 = vmatpush3.bf16.xpose.msk.msra.mxu0 %vm3432_vm12, %v1971_v23  ;;  %v1386_v42 = vsel %vm1361_vm4, %v1355_v11, %v2462_v32  ;;  %v1387_v13 = vsel %vm1361_vm4, %v1356_v33, %v2463_v4  ;;  %v1403_v46 = vsel %vm1392_vm5, %v1370_v38, %v2477_v8  ;;  %v1404_v54 = vsel %vm1392_vm5, %v1371_v51, %v2478_v12  ;;  %v4102_v38 = vld [vmem:[#allocation27_spill] sm:$0xff] }
 0x155   : > { %v2471_v61 = vpop.permute.xlu0 %2470  ;;  %v2486_v26 = vpop.permute.xlu1 %2485  ;;  %v2068_v51 = vunpack.i.h.bf16 %v4102_v38 }
 0x156   : > { %v2473_v18 = vunpack.i.h.bf16 %v2471_v61  ;;  %v2472_v21 = vunpack.i.l.bf16 %v2471_v61  ;;  %v2488_v44 = vunpack.i.h.bf16 %v2486_v26  ;;  %v2487_v16 = vunpack.i.l.bf16 %v2486_v26 }
 0x158   : > { %v1419_v15 = vsel %vm1392_vm5, %v1386_v42, %v2472_v21  ;;  %v1420_v49 = vsel %vm1392_vm5, %v1387_v13, %v2473_v18  ;;  %v1436_v43 = vsel %vm1425_vm6, %v1403_v46, %v2487_v16  ;;  %v1437_v5 = vsel %vm1425_vm6, %v1404_v54, %v2488_v44 }
 0x159   : > { %v2481_v41 = vpop.permute.xlu0 %2480  ;;  %v2067_v42 = vunpack.i.l.bf16 %v4102_v38 }
 0x15a   : > { %v2496_v56 = vpop.permute.xlu1 %2495  ;;  %v2483_v60 = vunpack.i.h.bf16 %v2481_v41  ;;  %v2482_v53 = vunpack.i.l.bf16 %v2481_v41 }
 0x15b   : > { %v2498_v50 = vunpack.i.h.bf16 %v2496_v56  ;;  %v2497_v40 = vunpack.i.l.bf16 %v2496_v56 }
 0x15c   : > { %v1452_v27 = vsel %vm1425_vm6, %v1419_v15, %v2482_v53  ;;  %v1453_v56 = vsel %vm1425_vm6, %v1420_v49, %v2483_v60  ;;  %v4104_v49 = vld [vmem:[#allocation8_spill] sm:$0xff] }
 0x15d   : > { %v2491_v30 = vpop.permute.xlu0 %2490  ;;  %v1469_v25 = vsel %vm1458_vm7, %v1436_v43, %v2497_v40  ;;  %v1470_v59 = vsel %vm1458_vm7, %v1437_v5, %v2498_v50  ;;  %v4103_v50 = vld [vmem:[#allocation30_spill] sm:$0xff]  ;;  %v1342_v43 = vsel %vm1330_vm3, %v4104_v49, %v2068_v51  ;;  %v4105_v5 = vld [vmem:[#allocation7_spill] sm:$0xff] }
 0x15e   : > { %v2506_v10 = vpop.permute.xlu1 %2505  ;;  %v2493_v47 = vunpack.i.h.bf16 %v2491_v30  ;;  %v2492_v23 = vunpack.i.l.bf16 %v2491_v30  ;;  %v2108_v40 = vunpack.i.h.bf16 %v4103_v50  ;;  %v2107_v46 = vunpack.i.l.bf16 %v4103_v50 }
 0x15f   : > { %v2508_v14 = vunpack.i.h.bf16 %v2506_v10  ;;  %v2507_v48 = vunpack.i.l.bf16 %v2506_v10  ;;  %v1341_v60 = vsel %vm1330_vm3, %v4105_v5, %v2067_v42 }
 0x160   : > { %v1485_v19 = vsel %vm1458_vm7, %v1452_v27, %v2492_v23  ;;  %v1486_v58 = vsel %vm1458_vm7, %v1453_v56, %v2493_v47 }
 0x161   : > { %v3798_v2 = vpop.permute.xlu0 %2500  ;;  %v1502_v6 = vsel %vm1491_vm8, %v1469_v25, %v2507_v48  ;;  %v1503_v17 = vsel %vm1491_vm8, %v1470_v59, %v2508_v14 }
 0x162   : > { %v2516_v0 = vpop.permute.xlu1 %2515  ;;  %v2503_v3 = vunpack.i.h.bf16 %v3798_v2  ;;  %v2502_v63 = vunpack.i.l.bf16 %v3798_v2 }
 0x163   : > { %v2518_v45 = vunpack.i.h.bf16 %v2516_v0  ;;  %v2517_v35 = vunpack.i.l.bf16 %v2516_v0 }
 0x164   : > { %v1518_v30 = vsel %vm1491_vm8, %v1485_v19, %v2502_v63  ;;  %v1519_v34 = vsel %vm1491_vm8, %v1486_v58, %v2503_v3 }
 0x165   : > { %v3808_v55 = vpop.permute.xlu0 %2510  ;;  %v1535_v20 = vsel %vm1524_vm9, %v1502_v6, %v2517_v35  ;;  %v1536_v57 = vsel %vm1524_vm9, %v1503_v17, %v2518_v45  ;;  %v4106_v6 = vld [vmem:[#allocation20_spill] sm:$0xff] }
 0x166   : > { %v2526_v61 = vpop.permute.xlu1 %2525  ;;  %v2513_v26 = vunpack.i.h.bf16 %v3808_v55  ;;  %v2512_v41 = vunpack.i.l.bf16 %v3808_v55  ;;  %v1358_v17 = vsel %vm1330_vm3, %v4106_v6, %v2108_v40 }
 0x167   : > { %v2528_v24 = vunpack.i.h.bf16 %v2526_v61  ;;  %v2527_v29 = vunpack.i.l.bf16 %v2526_v61  ;;  %v4107_v61 = vld [vmem:[#allocation19_spill] sm:$0xff] }
 0x168   : > { %v1551_v12 = vsel %vm1524_vm9, %v1518_v30, %v2512_v41  ;;  %v1552_v8 = vsel %vm1524_vm9, %v1519_v34, %v2513_v26 }
 0x169   : > { %v1568_v9 = vsel %vm1557_vm10, %v1535_v20, %v2527_v29  ;;  %v1569_v4 = vsel %vm1557_vm10, %v1536_v57, %v2528_v24  ;;  %v3824_v32 = vpop.permute.xlu0 %2520  ;;  %v1357_v24 = vsel %vm1330_vm3, %v4107_v61, %v2107_v46 }
 0x16a   : > { %v2523_v1 = vunpack.i.h.bf16 %v3824_v32  ;;  %v2522_v39 = vunpack.i.l.bf16 %v3824_v32  ;;  %v2536_v22 = vpop.permute.xlu1 %2535  ;;  %v1977_v10 = vpack.c.bf16 %v1569_v4, %v1568_v9 }
 0x16b   : > { %v2538_v54 = vunpack.i.h.bf16 %v2536_v22  ;;  %v2537_v14 = vunpack.i.l.bf16 %v2536_v22 }
 0x16c   : > { %v1584_v18 = vsel %vm1557_vm10, %v1551_v12, %v2522_v39  ;;  %v1585_v21 = vsel %vm1557_vm10, %v1552_v8, %v2523_v1 }
 0x16d   : > { %v1974_v44 = vpack.c.bf16 %v1585_v21, %v1584_v18  ;;  %v2531_v16 = vpop.permute.xlu0 %2530  ;;  %v1373_v29 = vsel %vm1361_vm4, %v1342_v43, %v2538_v54  ;;  %v1372_v27 = vsel %vm1361_vm4, %v1341_v60, %v2537_v14 }
 0x16e   : > { %v2546_v28 = vpop.permute.xlu1 %2545  ;;  %v2533_v48 = vunpack.i.h.bf16 %v2531_v16  ;;  %v2532_v0 = vunpack.i.l.bf16 %v2531_v16 }
 0x16f   : > { %1976 = vmatprep.subr.msk.bf16.mxu0 %vm3432_vm12, %v1974_v44  ;;  %v2548_v53 = vunpack.i.h.bf16 %v2546_v28  ;;  %v2547_v45 = vunpack.i.l.bf16 %v2546_v28 }
 0x170   : > { %1979 = vmatpush3.bf16.xpose.msk.msra.mxu0 %vm3432_vm12, %v1977_v10  ;;  %v1389_v56 = vsel %vm1361_vm4, %v1358_v17, %v2533_v48  ;;  %v1388_v20 = vsel %vm1361_vm4, %v1357_v24, %v2532_v0 }
 0x171   : > { %v2541_v33 = vpop.permute.xlu0 %2540  ;;  %v1405_v9 = vsel %vm1392_vm5, %v1372_v27, %v2547_v45  ;;  %v1406_v4 = vsel %vm1392_vm5, %v1373_v29, %v2548_v53 }
 0x172   : > { %v2556_v31 = vpop.permute.xlu1 %2555  ;;  %v2543_v25 = vunpack.i.h.bf16 %v2541_v33  ;;  %v2542_v59 = vunpack.i.l.bf16 %v2541_v33 }
 0x173   : > { %v2558_v47 = vunpack.i.h.bf16 %v2556_v31  ;;  %v2557_v23 = vunpack.i.l.bf16 %v2556_v31 }
 0x174   : > { %v1421_v12 = vsel %vm1392_vm5, %v1388_v20, %v2542_v59  ;;  %v1422_v8 = vsel %vm1392_vm5, %v1389_v56, %v2543_v25 }
 0x175   : > { %v2551_v11 = vpop.permute.xlu0 %2550  ;;  %v1438_v10 = vsel %vm1425_vm6, %v1405_v9, %v2557_v23  ;;  %v1439_v18 = vsel %vm1425_vm6, %v1406_v4, %v2558_v47 }
 0x176   : > { %v2566_v13 = vpop.permute.xlu1 %2565  ;;  %v2553_v21 = vunpack.i.h.bf16 %v2551_v11  ;;  %v2552_v44 = vunpack.i.l.bf16 %v2551_v11 }
 0x177   : > { %v2568_v57 = vunpack.i.h.bf16 %v2566_v13  ;;  %v2567_v19 = vunpack.i.l.bf16 %v2566_v13 }
 0x178   : > { %v1454_v49 = vsel %vm1425_vm6, %v1421_v12, %v2552_v44  ;;  %v1455_v43 = vsel %vm1425_vm6, %v1422_v8, %v2553_v21 }
 0x179   : > { %v2561_v15 = vpop.permute.xlu0 %2560  ;;  %v1471_v33 = vsel %vm1458_vm7, %v1438_v10, %v2567_v19  ;;  %v1472_v31 = vsel %vm1458_vm7, %v1439_v18, %v2568_v57 }
 0x17a   : > { %v2576_v35 = vpop.permute.xlu1 %2575  ;;  %v2563_v38 = vunpack.i.h.bf16 %v2561_v15  ;;  %v2562_v51 = vunpack.i.l.bf16 %v2561_v15 }
 0x17b   : > { %v2578_v30 = vunpack.i.h.bf16 %v2576_v35  ;;  %v2577_v34 = vunpack.i.l.bf16 %v2576_v35 }
 0x17c   : > { %v1487_v60 = vsel %vm1458_vm7, %v1454_v49, %v2562_v51  ;;  %v1488_v53 = vsel %vm1458_vm7, %v1455_v43, %v2563_v38  ;;  %v4110_v38 = vld [vmem:[#allocation25_spill] sm:$0xff] }
 0x17d   : > { %v2571_v58 = vpop.permute.xlu0 %2570  ;;  %v1504_v13 = vsel %vm1491_vm8, %v1471_v33, %v2577_v34  ;;  %v1505_v50 = vsel %vm1491_vm8, %v1472_v31, %v2578_v30  ;;  %v4109_v34 = vld [vmem:[#allocation32_spill] sm:$0xff] }
 0x17e   : > { %v2586_v22 = vpop.permute.xlu1 %2585  ;;  %v2573_v40 = vunpack.i.h.bf16 %v2571_v58  ;;  %v2572_v46 = vunpack.i.l.bf16 %v2571_v58  ;;  %v4108_v58 = vld [vmem:[#allocation29_spill] sm:$0xff]  ;;  %v2112_v12 = vunpack.i.l.bf16 %v4109_v34 }
 0x17f   : > { %v2588_v16 = vunpack.i.h.bf16 %v2586_v22  ;;  %v2587_v28 = vunpack.i.l.bf16 %v2586_v22  ;;  %v2073_v9 = vunpack.i.h.bf16 %v4108_v58  ;;  %v2072_v4 = vunpack.i.l.bf16 %v4108_v58 }
 0x180   : > { %v1520_v59 = vsel %vm1491_vm8, %v1487_v60, %v2572_v46  ;;  %v1521_v47 = vsel %vm1491_vm8, %v1488_v53, %v2573_v40  ;;  %v2113_v22 = vunpack.i.h.bf16 %v4109_v34  ;;  %v1359_v51 = vsel %vm1330_vm3, %v4110_v38, %v2112_v12 }
 0x181   : > { %v2581_v42 = vpop.permute.xlu0 %2580  ;;  %v1537_v5 = vsel %vm1524_vm9, %v1504_v13, %v2587_v28  ;;  %v1538_v15 = vsel %vm1524_vm9, %v1505_v50, %v2588_v16  ;;  %v1344_v21 = vsel %vm1330_vm3, %v4080_v52, %v2073_v9  ;;  %v1343_v44 = vsel %vm1330_vm3, %v4079_v62, %v2072_v4 }
 0x182   : > { %v2596_v54 = vpop.permute.xlu1 %2595  ;;  %v2583_v14 = vunpack.i.h.bf16 %v2581_v42  ;;  %v2582_v48 = vunpack.i.l.bf16 %v2581_v42  ;;  %v1360_v31 = vsel %vm1330_vm3, %v4083_v37, %v2113_v22 }
 0x183   : > { %v2598_v0 = vunpack.i.h.bf16 %v2596_v54  ;;  %v2597_v11 = vunpack.i.l.bf16 %v2596_v54 }
 0x184   : > { %v1553_v61 = vsel %vm1524_vm9, %v1520_v59, %v2582_v48  ;;  %v1554_v24 = vsel %vm1524_vm9, %v1521_v47, %v2583_v14 }
 0x185   : > { %v1570_v45 = vsel %vm1557_vm10, %v1537_v5, %v2597_v11  ;;  %v1571_v35 = vsel %vm1557_vm10, %v1538_v15, %v2598_v0  ;;  %v2591_v25 = vpop.permute.xlu0 %2590 }
 0x186   : > { %v2593_v23 = vunpack.i.h.bf16 %v2591_v25  ;;  %v2592_v6 = vunpack.i.l.bf16 %v2591_v25  ;;  %v2606_v17 = vpop.permute.xlu1 %2605  ;;  %v1983_v29 = vpack.c.bf16 %v1571_v35, %v1570_v45 }
 0x187   : > { %v2608_v10 = vunpack.i.h.bf16 %v2606_v17  ;;  %v2607_v18 = vunpack.i.l.bf16 %v2606_v17 }
 0x188   : > { %v1586_v27 = vsel %vm1557_vm10, %v1553_v61, %v2592_v6  ;;  %v1587_v56 = vsel %vm1557_vm10, %v1554_v24, %v2593_v23 }
 0x189   : > { %v1980_v20 = vpack.c.bf16 %v1587_v56, %v1586_v27  ;;  %v2601_v57 = vpop.permute.xlu0 %2600  ;;  %v1374_v52 = vsel %vm1361_vm4, %v1343_v44, %v2607_v18  ;;  %v1375_v62 = vsel %vm1361_vm4, %v1344_v21, %v2608_v10 }
 0x18a   : > { %v2616_v19 = vpop.permute.xlu1 %2615  ;;  %v2603_v16 = vunpack.i.h.bf16 %v2601_v57  ;;  %v2602_v28 = vunpack.i.l.bf16 %v2601_v57 }
 0x18b   : > { %1982 = vmatprep.subr.msk.bf16.mxu0 %vm3432_vm12, %v1980_v20  ;;  %v2618_v50 = vunpack.i.h.bf16 %v2616_v19  ;;  %v2617_v40 = vunpack.i.l.bf16 %v2616_v19 }
 0x18c   : > { %1985 = vmatpush3.bf16.xpose.msk.msra.mxu0 %vm3432_vm12, %v1983_v29  ;;  %v1390_v11 = vsel %vm1361_vm4, %v1359_v51, %v2602_v28  ;;  %v1391_v37 = vsel %vm1361_vm4, %v1360_v31, %v2603_v16 }
 0x18d   : > { %v2611_v30 = vpop.permute.xlu0 %2610  ;;  %v1407_v35 = vsel %vm1392_vm5, %v1374_v52, %v2617_v40  ;;  %v1408_v25 = vsel %vm1392_vm5, %v1375_v62, %v2618_v50 }
 0x18e   : > { %v2626_v8 = vpop.permute.xlu1 %2625  ;;  %v2613_v42 = vunpack.i.h.bf16 %v2611_v30  ;;  %v2612_v13 = vunpack.i.l.bf16 %v2611_v30 }
 0x18f   : > { %v2628_v48 = vunpack.i.h.bf16 %v2626_v8  ;;  %v2627_v0 = vunpack.i.l.bf16 %v2626_v8 }
 0x190   : > { %v1423_v15 = vsel %vm1392_vm5, %v1390_v11, %v2612_v13  ;;  %v1424_v60 = vsel %vm1392_vm5, %v1391_v37, %v2613_v42 }
 0x191   : > { %v2621_v33 = vpop.permute.xlu0 %2620  ;;  %v1440_v23 = vsel %vm1425_vm6, %v1407_v35, %v2627_v0  ;;  %v1441_v6 = vsel %vm1425_vm6, %v1408_v25, %v2628_v48 }
 0x192   : > { %v2623_v46 = vunpack.i.h.bf16 %v2621_v33  ;;  %v2622_v54 = vunpack.i.l.bf16 %v2621_v33  ;;  %v2636_v14 = vpop.permute.xlu1 %2635 }
 0x193   : > { %v2638_v49 = vunpack.i.h.bf16 %v2636_v14  ;;  %v2637_v43 = vunpack.i.l.bf16 %v2636_v14 }
 0x194   : > { %v1456_v59 = vsel %vm1425_vm6, %v1423_v15, %v2622_v54  ;;  %v1457_v47 = vsel %vm1425_vm6, %v1424_v60, %v2623_v46 }
 0x195   : > { %v2631_v5 = vpop.permute.xlu0 %2630  ;;  %v1473_v29 = vsel %vm1458_vm7, %v1440_v23, %v2637_v43  ;;  %v1474_v27 = vsel %vm1458_vm7, %v1441_v6, %v2638_v49 }
 0x196   : > { %v2633_v53 = vunpack.i.h.bf16 %v2631_v5  ;;  %v2632_v45 = vunpack.i.l.bf16 %v2631_v5  ;;  %v2646_v24 = vpop.permute.xlu1 %2645 }
 0x197   : > { %v2648_v30 = vunpack.i.h.bf16 %v2646_v24  ;;  %v2647_v34 = vunpack.i.l.bf16 %v2646_v24 }
 0x198   : > { %v1489_v17 = vsel %vm1458_vm7, %v1456_v59, %v2632_v45  ;;  %v1490_v61 = vsel %vm1458_vm7, %v1457_v47, %v2633_v53 }
 0x199   : > { %v1522_v56 = vsel %vm1491_vm8, %v1489_v17, %v2502_v63  ;;  %v1523_v20 = vsel %vm1491_vm8, %v1490_v61, %v2503_v3  ;;  %v2641_v57 = vpop.permute.xlu0 %2640 }
 0x19a   : > { %v2643_v19 = vunpack.i.h.bf16 %v2641_v57  ;;  %v2642_v58 = vunpack.i.l.bf16 %v2641_v57  ;;  %v1555_v9 = vsel %vm1524_vm9, %v1522_v56, %v2512_v41  ;;  %v1556_v4 = vsel %vm1524_vm9, %v1523_v20, %v2513_v26 }
 0x19b   : > { %v1588_v63 = vsel %vm1557_vm10, %v1555_v9, %v2522_v39  ;;  %v1589_v2 = vsel %vm1557_vm10, %v1556_v4, %v2523_v1 }
 0x19c   : > { %v1506_v3 = vsel %vm1491_vm8, %v1473_v29, %v2642_v58  ;;  %v1507_v22 = vsel %vm1491_vm8, %v1474_v27, %v2643_v19  ;;  %v1986_v12 = vpack.c.bf16 %v1589_v2, %v1588_v63 }
 0x19d   : > { %v2651_v41 = vpop.permute.xlu0 %2650  ;;  %v1539_v26 = vsel %vm1524_vm9, %v1506_v3, %v2647_v34  ;;  %v1540_v10 = vsel %vm1524_vm9, %v1507_v22, %v2648_v30 }
 0x19e   : > { %v2653_v8 = vunpack.i.h.bf16 %v2651_v41  ;;  %v2652_v55 = vunpack.i.l.bf16 %v2651_v41  ;;  %1988 = vmatprep.subr.msk.bf16.mxu0 %vm3432_vm12, %v1986_v12 }
 0x1a0   : > { %v1572_v39 = vsel %vm1557_vm10, %v1539_v26, %v2652_v55  ;;  %v1573_v32 = vsel %vm1557_vm10, %v1540_v10, %v2653_v8 }
 0x1a1   : > { %v1989_v1 = vpack.c.bf16 %v1573_v32, %v1572_v39 }
 0x1a3   : > { %1991 = vmatpush3.bf16.xpose.msk.msra.mxu0 %vm3432_vm12, %v1989_v1 }
 0x1aa   : > { %1943 = vmatmul.mubr.msk.f32.vlgmr.msra.gmra.mrb[0].mxu0 %vm1591_vm11, %v3684_v7 }
 0x27d   : > { %v1757_v18 = vpop.f32.mrb[0].mxu0 }
 0x27e   : > { %v1766_v21 = vmul.f32 %v1757_v18, %v1757_v18  ;;  %v1759_v44 = vpop.f32.mrb[1].mxu0 }
 0x27f   : > { %v1762_v16 = vadd.f32 %v1759_v44, %v1757_v18  ;;  %v1767_v28 = vmul.f32 %v1759_v44, %v1759_v44 }
 0x281   : > { %v1768_v33 = vadd.f32 %v1767_v28, %v1766_v21  ;;  %1763 = vadd.xlane.f32.xlu1 %v1762_v16 }
 0x283   : > { %1769 = vadd.xlane.f32.xlu0 %v1768_v33 }
 0x30e   : > { %v1764_v31 = vpop.xlane.xlu1 %1763 }
 0x30f   : > { %v1765_v38 = vmul.f32 0.00390625, %v1764_v31 }
 0x310   : > { %v1770_v51 = vpop.xlane.xlu0 %1769 }
 0x311   : > { %v1771_v42 = vmul.f32 0.00390625, %v1770_v51  ;;  %v1772_v13 = vmul.f32 %v1765_v38, %v1765_v38  ;;  %v1775_v7 = vsub.f32 %v1757_v18, %v1765_v38  ;;  %v1776_v46 = vsub.f32 %v1759_v44, %v1765_v38 }
 0x313   : > { %v1773_v36 = vsub.f32 %v1771_v42, %v1772_v13 }
 0x315   : > { %v1774_v50 = vmax.f32 %v1773_v36, 0.0 }
 0x317   : > { %v1777_v40 = vadd.f32 1e-05, %v1774_v50 }
 0x319   : > { %2654 = vrsqrt.f32 %v1777_v40 }
 0x323   : > { %v2655_v54 = vpop.eup %2654 }
 0x324   : > { %v1779_v14 = vmul.f32 %v2655_v54, %v1775_v7  ;;  %v1780_v52 = vmul.f32 %v2655_v54, %v1776_v46 }
 0x326   : > { %vm1781_vm13 = vcmp.ge.f32.partialorder %v1779_v14, 0.0  ;;  %vm1782_vm14 = vcmp.ge.f32.partialorder %v1780_v52, 0.0  ;;  %v1783_v62 = vmul.f32 0.2, %v1779_v14  ;;  %v1784_v48 = vmul.f32 0.2, %v1780_v52 }
 0x328   : > { %v1785_v0 = vsel %vm1781_vm13, %v1779_v14, %v1783_v62  ;;  %v1786_v11 = vsel %vm1782_vm14, %v1780_v52, %v1784_v48 }
 0x329   : > { %1787 = vst [vmem:[%s136_s17] sm:$0xff] %v1785_v0  ;;  %1788 = vst [vmem:[%s136_s17 + $0x8] sm:$0xff] %v1786_v11 }
 0x32a   : > { %2669 = shalt.err (!%p2666_p3)
}
 0x32b   : > { %s2670_s29 = scalar_lea.hbm %s3957_s24, 256  ;;  %s2674_s4 = scalar_lea.hbm %s4001_s2, 512 }
 0x32c   : > { %p2671_p4 = scmp.ne.s32.totalorder %s3957_s24, %s2670_s29  ;;  %p2675_p9 = scmp.lt.u32.totalorder %s3957_s24, %s4001_s2 }
 0x32d   : > { %p2676_p10 = scmp.lt.u32.totalorder %s2674_s4, %s2670_s29  ;;  %p2678_p12 = scmp.lt.u32.totalorder %s2670_s29, %s3957_s24 }
 0x32e   : > { %p2672_p7 = pnand %p2671_p4, %p2782_p5 }
 0x32f   : > { %p2677_p11 = por %p2676_p10, %p2675_p9 }
 0x330   : > { %p2673_p8 = pneg %p2672_p7 }
 0x331   : > { %p2679_p13 = por %p2678_p12, %p2677_p11 }
 0x333   : > { %p2680_p0 = pnand %p2679_p13, %p2673_p8 }
 0x335   : > { %2683 = shalt.err (!%p2680_p0)
}
 0x336   : > { %1992 = dma.vmem_to_hbm [thread:$0]  (%p2782_p5), %s3959_s21, 256, %s3957_s24, %s1790_s13  }
 0x337 PF: > { %p1998_p1 = scmp.ge.s32.totalorder %s2718_s12, 2  ;;  %s1816_s7 = sand.u32 1, %s2706_s9  }
 0x338   : > { %s1817_s8 = scalar_lea.sflag [#allocation3], %s1816_s7 }
 0x339   : > { %p1995_p2 = pnand %p1998_p1, %p2786_p6 }
 0x33b   : > { %2701 = dma.done.wait (!%p1995_p2), %s1817_s8, 256  }
 0x33c   : > { %2703 = vsyncadd (!%p1995_p2), %s1817_s8, 4294967040  ;;  %p12_p3 = scmp.ge.s32.totalorder %s2769_s15, 4   ;;  %s4111_s9 = smov %s2710_s10 }
 0x33d   : > { %s4112_s10 = smov %s2714_s11  ;;  %s4113_s11 = smov %s2780_s18 }
 0x33e   : > { %s4114_s12 = smov %s2769_s15  ;;  %14 = sbr.rel (!%p12_p3) target bundleno = 3 (0x3), region = 63 }
 0x345   :  { %1822 = vsyncpa [#allocation3], 1 }
 0x346   :  { %1824 = vsyncpa [#allocation3 + $0x1], 1 }

</bundles_post_ra>
